<compile_context>
chip_gen: v7x
topology: tpu7x:2x2x1
jax: 0.10.0
libtpu: 0.0.40
codegen_flags: <defaults>
</compile_context>

<pallas_src>
import math
import jax
import jax.numpy as jnp
from jax.experimental import pallas as pl
from jax.experimental.pallas import tpu as pltpu

# ---- model hyper-parameters (small, consistent with a transformer encoder) ----
B, S, H = 2, 8, 32          # batch, sequence length, hidden size
NH, DH = 2, 16              # attention heads, head dim
FFN = 64                    # feed-forward hidden size
VOCAB = 50                  # vocabulary size
LAYERS = 2                  # number of transformer layers
R = 4                       # LoRA rank
LORA_ALPHA = 8.0
LORA_SCALE = LORA_ALPHA / R
EPS = 1e-12                 # BERT-style layernorm epsilon
T = B * S                   # tokens (batch folded into token axis)
ATT_SCALE = 1.0 / math.sqrt(DH)

# ---- padded / packed layout constants --------------------------------------
HP = 128                    # hidden size padded to one full lane group
FP = 128                    # FFN size padded to one full lane group
P_ROWS = 8                  # rows in the per-layer f32 bias/LN slab
ROW_QKV = 0                 # fused QKV weights:   rows [0, 128)
ROW_WO = HP                 # per-head O weights:  rows [128, 160)
ROW_W1 = ROW_WO + NH * DH   # FFN up   weights:    rows [160, 288)
ROW_W2 = ROW_W1 + HP        # FFN down weights:    rows [288, 416)
W_ROWS = ROW_W2 + FP        # 416 rows per layer in the bf16 weight slab


def _layernorm(x, g, b):
    mu = jnp.mean(x, axis=-1, keepdims=True)
    var = jnp.mean((x - mu) ** 2, axis=-1, keepdims=True)
    return (x - mu) * jax.lax.rsqrt(var + EPS) * g + b


def _layernorm_padded(x, g, b):
    """LayerNorm over the first H lanes of a [T, HP] array whose lanes >= H are
    exactly zero.  Uses E[x]/E[x^2] so no lane mask is needed; gamma is padded
    with zeros so padded lanes come out exactly zero again."""
    mu = jnp.sum(x, axis=-1, keepdims=True) * (1.0 / H)
    ex2 = jnp.sum(x * x, axis=-1, keepdims=True) * (1.0 / H)
    var = ex2 - mu * mu
    return (x - mu) * jax.lax.rsqrt(var + EPS) * g + b


def _gelu(x):
    c = math.sqrt(2.0 / math.pi)
    return 0.5 * x * (1.0 + jnp.tanh(c * (x + 0.044715 * x * x * x)))


# ----------------------------- fused encoder kernel ----------------------------
def fused_encoder_kernel(x0_ref, bias_ref, w_ref, p_ref, out_ref):
    """Grid-less kernel: the whole LAYERS-deep encoder in one invocation.

    x0_ref  : [T, HP]            f32   embeddings (lanes >= H are zero)
    bias_ref: [T, T]             f32   block-diag + key-padding additive bias
    w_ref   : [LAYERS, W_ROWS, HP] bf16  packed matmul weights (QKV|WO|W1|W2)
    p_ref   : [LAYERS, P_ROWS, HP] f32   packed biases / layernorm params
    out_ref : [LAYERS, T, HP]    f32   per-layer hidden states (lane-dense)
    """
    x = x0_ref[...]                       # residual stream, stays in registers/VMEM
    bias = bias_ref[...]                  # [T, T]

    for l in range(LAYERS):               # static unroll (everything fits in VMEM)
        xb = x.astype(jnp.bfloat16)

        # --- fused Q|K|V projection for all heads: one [T,128]x[128,128] push ---
        qkv = jnp.dot(xb, w_ref[l, ROW_QKV:ROW_QKV + HP, :],
                      preferred_element_type=jnp.float32) + p_ref[l, 0:1, :]

        # --- attention (batch folded into tokens; NH=2 statically unrolled) ---
        attn = None
        for h in range(NH):
            qh = qkv[:, h * DH:(h + 1) * DH]                      # [T, DH]
            kh = qkv[:, H + h * DH:H + (h + 1) * DH]              # [T, DH]
            vh = qkv[:, 2 * H + h * DH:2 * H + (h + 1) * DH]      # [T, DH]
            sc = jnp.einsum('qd,kd->qk', qh, kh,
                            preferred_element_type=jnp.float32) + bias   # [T, T]
            m = jnp.max(sc, axis=-1, keepdims=True)
            pexp = jnp.exp(sc - m)
            pexp = pexp * pl.reciprocal(jnp.sum(pexp, axis=-1, keepdims=True),
                                        approx=True)
            ctx = jnp.dot(pexp, vh, preferred_element_type=jnp.float32)  # [T, DH]
            part = jnp.dot(ctx.astype(jnp.bfloat16),
                           w_ref[l, ROW_WO + h * DH:ROW_WO + (h + 1) * DH, :],
                           preferred_element_type=jnp.float32)           # [T, HP]
            attn = part if attn is None else attn + part

        attn = attn + p_ref[l, 1:2, :]                            # + bo
        h1 = _layernorm_padded(x + attn, p_ref[l, 2:3, :], p_ref[l, 3:4, :])

        # --- feed-forward (bf16 MXU operands, f32 elementwise) ---
        ff = jnp.dot(h1.astype(jnp.bfloat16), w_ref[l, ROW_W1:ROW_W1 + HP, :],
                     preferred_element_type=jnp.float32) + p_ref[l, 4:5, :]
        ff = _gelu(ff)
        ff = jnp.dot(ff.astype(jnp.bfloat16), w_ref[l, ROW_W2:ROW_W2 + FP, :],
                     preferred_element_type=jnp.float32) + p_ref[l, 5:6, :]
        x = _layernorm_padded(h1 + ff, p_ref[l, 6:7, :], p_ref[l, 7:8, :])

        out_ref[l] = x                    # lane-dense [T, 128] store for layer l


def _cost_estimate():
    per_layer_flops = (2 * T * HP * HP                     # fused QKV projection
                       + NH * (2 * T * T * DH) * 2         # scores + context
                       + NH * (2 * T * DH * HP)            # per-head O projection
                       + 2 * T * HP * FP * 2)              # two FFN matmuls
    flops = LAYERS * per_layer_flops
    trans = LAYERS * (NH * T * T + T * FP + NH * T + 4 * T)  # exp, tanh, recip, rsqrt
    bytes_accessed = (4 * T * HP + 4 * T * T
                      + 2 * LAYERS * W_ROWS * HP            # bf16 weight slab
                      + 4 * LAYERS * P_ROWS * HP            # f32 param slab
                      + 4 * LAYERS * T * HP)                # stacked layer outputs
    return pl.CostEstimate(flops=flops, transcendentals=trans,
                           bytes_accessed=bytes_accessed)


def fused_encoder(x0_pad, attn_bias, w_slab, p_slab):
    """Runs the whole encoder in a single grid-less pallas_call."""
    vmem = pl.BlockSpec(memory_space=pltpu.MemorySpace.VMEM)
    return pl.pallas_call(
        fused_encoder_kernel,
        out_shape=jax.ShapeDtypeStruct((LAYERS, T, HP), jnp.float32),
        in_specs=[vmem, vmem, vmem, vmem],
        out_specs=vmem,
        compiler_params=pltpu.CompilerParams(vmem_limit_bytes=32 * 1024 * 1024),
        cost_estimate=_cost_estimate(),
    )(x0_pad, attn_bias, w_slab, p_slab)


# ------------------------- parameter initialization ---------------------------
def init_params(key):
    def nrm(k, shape, scale=0.02):
        return (scale * jax.random.normal(k, shape)).astype(jnp.float32)

    keys = iter(jax.random.split(key, 8 + LAYERS * 16))
    params = {
        'word_emb': nrm(next(keys), (VOCAB, H)),
        'pos_emb': nrm(next(keys), (S, H)),
        'emb_ln_g': jnp.ones((1, 1, H), jnp.float32),
        'emb_ln_b': jnp.zeros((1, 1, H), jnp.float32),
        'layers': [],
    }
    for _ in range(LAYERS):
        lp = (
            nrm(next(keys), (H, H)),              # wq
            nrm(next(keys), (H, H)),              # wk
            nrm(next(keys), (H, H)),              # wv
            nrm(next(keys), (H, H)),              # wo
            jnp.zeros((1, H), jnp.float32),       # bq
            jnp.zeros((1, H), jnp.float32),       # bk
            jnp.zeros((1, H), jnp.float32),       # bv
            jnp.zeros((1, H), jnp.float32),       # bo
            nrm(next(keys), (H, R)),              # LoRA A (q)
            nrm(next(keys), (R, H), scale=0.01),  # LoRA B (q)
            nrm(next(keys), (H, R)),              # LoRA A (v)
            nrm(next(keys), (R, H), scale=0.01),  # LoRA B (v)
            jnp.ones((1, H), jnp.float32),        # ln1 gamma
            jnp.zeros((1, H), jnp.float32),       # ln1 beta
            nrm(next(keys), (H, FFN)),            # w1
            jnp.zeros((1, FFN), jnp.float32),     # b1
            nrm(next(keys), (FFN, H)),            # w2
            jnp.zeros((1, H), jnp.float32),       # b2
            jnp.ones((1, H), jnp.float32),        # ln2 gamma
            jnp.zeros((1, H), jnp.float32),       # ln2 beta
        )
        params['layers'].append(lp)
    return params


def prepare_stacked_params(params):
    """Host-side prep: merge LoRA, fold 1/sqrt(DH) into Q, fuse QKV, zero-pad to
    128 lanes, and pack each layer into one bf16 weight slab + one f32 param slab."""
    def pad2(w, rows, cols):
        return jnp.pad(w, ((0, rows - w.shape[0]), (0, cols - w.shape[1])))

    def padrow(v, n=HP):
        v = v.reshape(-1)
        return jnp.pad(v, (0, n - v.shape[0]))     # LN gammas padded with ZEROS

    w_layers, p_layers = [], []
    for lp in params['layers']:
        (wq, wk, wv, wo, bq, bk, bv, bo, aq, bql, av, bvl,
         ln1g, ln1b, w1, b1, w2, b2, ln2g, ln2b) = lp
        wq_eff = (wq + LORA_SCALE * (aq @ bql)) * ATT_SCALE   # LoRA + scale folded
        wv_eff = wv + LORA_SCALE * (av @ bvl)                 # LoRA folded
        wqkv = pad2(jnp.concatenate([wq_eff, wk, wv_eff], axis=1), HP, HP)
        wo_p = pad2(wo, NH * DH, HP)                          # rows = head-major ctx dims
        w1_p = pad2(w1, HP, FP)
        w2_p = pad2(w2, FP, HP)
        w_layers.append(jnp.concatenate([wqkv, wo_p, w1_p, w2_p], axis=0))  # [416,128]

        bqkv = jnp.concatenate([bq.reshape(-1) * ATT_SCALE,
                                bk.reshape(-1), bv.reshape(-1)])             # [96]
        p_layers.append(jnp.stack([padrow(bqkv), padrow(bo),
                                   padrow(ln1g), padrow(ln1b),
                                   padrow(b1), padrow(b2),
                                   padrow(ln2g), padrow(ln2b)], axis=0))     # [8,128]

    w_slab = jnp.stack(w_layers, axis=0).astype(jnp.bfloat16)  # [LAYERS, 416, 128]
    p_slab = jnp.stack(p_layers, axis=0).astype(jnp.float32)   # [LAYERS, 8, 128]
    return w_slab, p_slab


# ------------------------------ forward pass ----------------------------------
def encoder_forward(input_ids, attention_mask, params):
    """Mirrors Encoder.forward: returns sentemb / wordemb / all_layers / mask."""
    mask_f = attention_mask.astype(jnp.float32)

    # Embedding lookup + position embeddings + embedding layernorm (glue, plain JAX).
    emb = jnp.take(params['word_emb'], input_ids, axis=0) + params['pos_emb'][None, :, :]
    hidden0 = _layernorm(emb, params['emb_ln_g'], params['emb_ln_b'])     # [B,S,H]

    # Batch folded into tokens: [T,T] block-diagonal same-batch mask AND key validity.
    bidx = jnp.repeat(jnp.arange(B), S)
    allow = ((bidx[:, None] == bidx[None, :]).astype(jnp.float32)
             * mask_f.reshape(T)[None, :])
    attn_bias = (allow - 1.0) * 1e9                                       # [T, T]

    x0_pad = jnp.pad(hidden0.reshape(T, H), ((0, 0), (0, HP - H)))        # [T, 128]
    w_slab, p_slab = prepare_stacked_params(params)

    layer_out = fused_encoder(x0_pad, attn_bias, w_slab, p_slab)          # [L,T,128]
    layer_out = layer_out[:, :, :H].reshape(LAYERS, B, S, H)

    all_layers = (hidden0,) + tuple(layer_out[i] for i in range(LAYERS))
    last_hidden_states = all_layers[-1]
    return {
        'sentemb': last_hidden_states[:, 0, :],        # CLS token embedding
        'wordemb': last_hidden_states,
        'all_layers': all_layers,
        'attention_mask': attention_mask,
    }


# --------------------- plain-JAX reference (for validation) -------------------
def encoder_forward_ref(input_ids, attention_mask, params):
    mask_f = attention_mask.astype(jnp.float32)
    emb = jnp.take(params['word_emb'], input_ids, axis=0) + params['pos_emb'][None, :, :]
    h = _layernorm(emb, params['emb_ln_g'], params['emb_ln_b'])
    neg = (1.0 - mask_f)[:, None, None, :] * (-1e9)
    for lp in params['layers']:
        (wq, wk, wv, wo, bq, bk, bv, bo, aq, bql, av, bvl,
         ln1g, ln1b, w1, b1, w2, b2, ln2g, ln2b) = lp
        x2 = h.reshape(T, H)
        q = (x2 @ wq + bq + LORA_SCALE * (x2 @ aq) @ bql).reshape(B, S, NH, DH)
        k = (x2 @ wk + bk).reshape(B, S, NH, DH)
        v = (x2 @ wv + bv + LORA_SCALE * (x2 @ av) @ bvl).reshape(B, S, NH, DH)
        sc = jnp.einsum('bqhd,bkhd->bhqk', q, k) / math.sqrt(DH) + neg
        p = jax.nn.softmax(sc, axis=-1)
        ctx = jnp.einsum('bhqk,bkhd->bqhd', p, v).reshape(T, H)
        h1 = _layernorm(x2 + ctx @ wo + bo, ln1g, ln1b)
        ff = _gelu(h1 @ w1 + b1) @ w2 + b2
        h = _layernorm(h1 + ff, ln2g, ln2b).reshape(B, S, H)
    return h


if __name__ == "__main__":
    root = jax.random.PRNGKey(0)
    k_param, k_ids = jax.random.split(root)

    params = init_params(k_param)
    input_ids = jax.random.randint(k_ids, (B, S), 0, VOCAB, dtype=jnp.int32)
    attention_mask = jnp.array([[1] * S, [1] * (S - 2) + [0] * 2], dtype=jnp.int32)

    out = jax.jit(encoder_forward)(input_ids, attention_mask, params)
    jax.block_until_ready(out)

    assert out['sentemb'].shape == (B, H)
    assert out['wordemb'].shape == (B, S, H)
    assert len(out['all_layers']) == LAYERS + 1
    assert out['attention_mask'].shape == (B, S)

    # Loose-tolerance correctness check vs. f32 plain-JAX reference
    # (kernel uses bf16 matmul operands + approx reciprocal).
    ref_last = encoder_forward_ref(input_ids, attention_mask, params)
    err = float(jnp.max(jnp.abs(out['wordemb'] - ref_last)))
    assert err < 5e-2, f"kernel deviates from reference: max abs err {err}"

    print("KERNEL_OK")
</pallas_src>

<mosaic_0001>
module attributes {stable_mosaic.version = 11 : i64} {
  func.func @fused_encoder_kernel(%arg0: memref<16x128xf32, #tpu.memory_space<vmem>>, %arg1: memref<16x16xf32, #tpu.memory_space<vmem>>, %arg2: memref<2x416x128xbf16, #tpu.memory_space<vmem>>, %arg3: memref<2x8x128xf32, #tpu.memory_space<vmem>>, %arg4: memref<2x16x128xf32, #tpu.memory_space<vmem>>) attributes {dimension_semantics = [], scalar_prefetch = 0 : i64, scratch_operands = 0 : i64, tpu.core_type = #tpu.core_type<tc>} {
    %c0 = arith.constant 0 : index
    %c0_0 = arith.constant 0 : index
    %0 = vector.load %arg0[%c0, %c0_0] : memref<16x128xf32, #tpu.memory_space<vmem>>, vector<16x128xf32>
    %c0_1 = arith.constant 0 : index
    %c0_2 = arith.constant 0 : index
    %1 = vector.load %arg1[%c0_1, %c0_2] : memref<16x16xf32, #tpu.memory_space<vmem>>, vector<16x16xf32>
    %2 = arith.truncf %0 : vector<16x128xf32> to vector<16x128xbf16>
    %c0_3 = arith.constant 0 : index
    %c0_4 = arith.constant 0 : index
    %c0_5 = arith.constant 0 : index
    %3 = vector.load %arg2[%c0_3, %c0_4, %c0_5] : memref<2x416x128xbf16, #tpu.memory_space<vmem>>, vector<1x128x128xbf16>
    %4 = vector.shape_cast %3 : vector<1x128x128xbf16> to vector<128x128xbf16>
    %cst = arith.constant dense<0.000000e+00> : vector<16x128xf32>
    %5 = tpu.matmul %2, %4, %cst {dimension_numbers = #tpu.dot_dimension_numbers<[1], [0], [0], [1], [0, 0, 1, 1], [], []>} : vector<16x128xbf16>, vector<128x128xbf16>, vector<16x128xf32> -> vector<16x128xf32>
    %c0_6 = arith.constant 0 : index
    %c0_7 = arith.constant 0 : index
    %c0_8 = arith.constant 0 : index
    %6 = vector.load %arg3[%c0_6, %c0_7, %c0_8] : memref<2x8x128xf32, #tpu.memory_space<vmem>>, vector<1x1x128xf32>
    %7 = vector.shape_cast %6 : vector<1x1x128xf32> to vector<1x128xf32>
    %8 = vector.broadcast %7 : vector<1x128xf32> to vector<16x128xf32>
    %9 = arith.addf %5, %8 : vector<16x128xf32>
    %10 = vector.extract_strided_slice %9 {offsets = [0, 0], sizes = [16, 16], strides = [1, 1]} : vector<16x128xf32> to vector<16x16xf32>
    %11 = vector.extract_strided_slice %9 {offsets = [0, 32], sizes = [16, 16], strides = [1, 1]} : vector<16x128xf32> to vector<16x16xf32>
    %12 = vector.extract_strided_slice %9 {offsets = [0, 64], sizes = [16, 16], strides = [1, 1]} : vector<16x128xf32> to vector<16x16xf32>
    "tpu.trace_start"() <{level = 10 : i32, message = "qd,kd->qk"}> : () -> ()
    %cst_9 = arith.constant dense<0.000000e+00> : vector<16x16xf32>
    %13 = tpu.matmul %10, %11, %cst_9 {dimension_numbers = #tpu.dot_dimension_numbers<[1], [1], [0], [0], [0, 0, 1, 0], [], []>} : vector<16x16xf32>, vector<16x16xf32>, vector<16x16xf32> -> vector<16x16xf32>
    "tpu.trace_stop"() : () -> ()
    %14 = arith.addf %13, %1 : vector<16x16xf32>
    %cst_10 = arith.constant dense<0xFF800000> : vector<16xf32>
    %15 = vector.multi_reduction <maximumf>, %14, %cst_10 [1] : vector<16x16xf32> to vector<16xf32>
    %16 = vector.shape_cast %15 : vector<16xf32> to vector<16x1xf32>
    %17 = vector.broadcast %16 : vector<16x1xf32> to vector<16x16xf32>
    %18 = arith.subf %14, %17 : vector<16x16xf32>
    %19 = math.exp %18 : vector<16x16xf32>
    %cst_11 = arith.constant dense<0.000000e+00> : vector<16xf32>
    %20 = vector.multi_reduction <add>, %19, %cst_11 [1] : vector<16x16xf32> to vector<16xf32>
    %21 = vector.shape_cast %20 : vector<16xf32> to vector<16x1xf32>
    %22 = tpu.reciprocal %21 {approx = true} : vector<16x1xf32> -> vector<16x1xf32>
    %23 = vector.broadcast %22 : vector<16x1xf32> to vector<16x16xf32>
    %24 = arith.mulf %19, %23 : vector<16x16xf32>
    %cst_12 = arith.constant dense<0.000000e+00> : vector<16x16xf32>
    %25 = tpu.matmul %24, %12, %cst_12 {dimension_numbers = #tpu.dot_dimension_numbers<[1], [0], [0], [1], [0, 0, 1, 1], [], []>} : vector<16x16xf32>, vector<16x16xf32>, vector<16x16xf32> -> vector<16x16xf32>
    %26 = arith.truncf %25 : vector<16x16xf32> to vector<16x16xbf16>
    %c0_13 = arith.constant 0 : index
    %c128 = arith.constant 128 : index
    %c0_14 = arith.constant 0 : index
    %27 = vector.load %arg2[%c0_13, %c128, %c0_14] : memref<2x416x128xbf16, #tpu.memory_space<vmem>>, vector<1x16x128xbf16>
    %28 = vector.shape_cast %27 : vector<1x16x128xbf16> to vector<16x128xbf16>
    %cst_15 = arith.constant dense<0.000000e+00> : vector<16x128xf32>
    %29 = tpu.matmul %26, %28, %cst_15 {dimension_numbers = #tpu.dot_dimension_numbers<[1], [0], [0], [1], [0, 0, 1, 1], [], []>} : vector<16x16xbf16>, vector<16x128xbf16>, vector<16x128xf32> -> vector<16x128xf32>
    %30 = vector.extract_strided_slice %9 {offsets = [0, 16], sizes = [16, 16], strides = [1, 1]} : vector<16x128xf32> to vector<16x16xf32>
    %31 = vector.extract_strided_slice %9 {offsets = [0, 48], sizes = [16, 16], strides = [1, 1]} : vector<16x128xf32> to vector<16x16xf32>
    %32 = vector.extract_strided_slice %9 {offsets = [0, 80], sizes = [16, 16], strides = [1, 1]} : vector<16x128xf32> to vector<16x16xf32>
    "tpu.trace_start"() <{level = 10 : i32, message = "qd,kd->qk"}> : () -> ()
    %cst_16 = arith.constant dense<0.000000e+00> : vector<16x16xf32>
    %33 = tpu.matmul %30, %31, %cst_16 {dimension_numbers = #tpu.dot_dimension_numbers<[1], [1], [0], [0], [0, 0, 1, 0], [], []>} : vector<16x16xf32>, vector<16x16xf32>, vector<16x16xf32> -> vector<16x16xf32>
    "tpu.trace_stop"() : () -> ()
    %34 = arith.addf %33, %1 : vector<16x16xf32>
    %cst_17 = arith.constant dense<0xFF800000> : vector<16xf32>
    %35 = vector.multi_reduction <maximumf>, %34, %cst_17 [1] : vector<16x16xf32> to vector<16xf32>
    %36 = vector.shape_cast %35 : vector<16xf32> to vector<16x1xf32>
    %37 = vector.broadcast %36 : vector<16x1xf32> to vector<16x16xf32>
    %38 = arith.subf %34, %37 : vector<16x16xf32>
    %39 = math.exp %38 : vector<16x16xf32>
    %cst_18 = arith.constant dense<0.000000e+00> : vector<16xf32>
    %40 = vector.multi_reduction <add>, %39, %cst_18 [1] : vector<16x16xf32> to vector<16xf32>
    %41 = vector.shape_cast %40 : vector<16xf32> to vector<16x1xf32>
    %42 = tpu.reciprocal %41 {approx = true} : vector<16x1xf32> -> vector<16x1xf32>
    %43 = vector.broadcast %42 : vector<16x1xf32> to vector<16x16xf32>
    %44 = arith.mulf %39, %43 : vector<16x16xf32>
    %cst_19 = arith.constant dense<0.000000e+00> : vector<16x16xf32>
    %45 = tpu.matmul %44, %32, %cst_19 {dimension_numbers = #tpu.dot_dimension_numbers<[1], [0], [0], [1], [0, 0, 1, 1], [], []>} : vector<16x16xf32>, vector<16x16xf32>, vector<16x16xf32> -> vector<16x16xf32>
    %46 = arith.truncf %45 : vector<16x16xf32> to vector<16x16xbf16>
    %c0_20 = arith.constant 0 : index
    %c144 = arith.constant 144 : index
    %c0_21 = arith.constant 0 : index
    %47 = vector.load %arg2[%c0_20, %c144, %c0_21] : memref<2x416x128xbf16, #tpu.memory_space<vmem>>, vector<1x16x128xbf16>
    %48 = vector.shape_cast %47 : vector<1x16x128xbf16> to vector<16x128xbf16>
    %cst_22 = arith.constant dense<0.000000e+00> : vector<16x128xf32>
    %49 = tpu.matmul %46, %48, %cst_22 {dimension_numbers = #tpu.dot_dimension_numbers<[1], [0], [0], [1], [0, 0, 1, 1], [], []>} : vector<16x16xbf16>, vector<16x128xbf16>, vector<16x128xf32> -> vector<16x128xf32>
    %50 = arith.addf %29, %49 : vector<16x128xf32>
    %c0_23 = arith.constant 0 : index
    %c1 = arith.constant 1 : index
    %c0_24 = arith.constant 0 : index
    %51 = vector.load %arg3[%c0_23, %c1, %c0_24] : memref<2x8x128xf32, #tpu.memory_space<vmem>>, vector<1x1x128xf32>
    %52 = vector.shape_cast %51 : vector<1x1x128xf32> to vector<1x128xf32>
    %53 = vector.broadcast %52 : vector<1x128xf32> to vector<16x128xf32>
    %54 = arith.addf %50, %53 : vector<16x128xf32>
    %55 = arith.addf %0, %54 : vector<16x128xf32>
    %c0_25 = arith.constant 0 : index
    %c2 = arith.constant 2 : index
    %c0_26 = arith.constant 0 : index
    %56 = vector.load %arg3[%c0_25, %c2, %c0_26] : memref<2x8x128xf32, #tpu.memory_space<vmem>>, vector<1x1x128xf32>
    %57 = vector.shape_cast %56 : vector<1x1x128xf32> to vector<1x128xf32>
    %c0_27 = arith.constant 0 : index
    %c3 = arith.constant 3 : index
    %c0_28 = arith.constant 0 : index
    %58 = vector.load %arg3[%c0_27, %c3, %c0_28] : memref<2x8x128xf32, #tpu.memory_space<vmem>>, vector<1x1x128xf32>
    %59 = vector.shape_cast %58 : vector<1x1x128xf32> to vector<1x128xf32>
    %cst_29 = arith.constant dense<0.000000e+00> : vector<16xf32>
    %60 = vector.multi_reduction <add>, %55, %cst_29 [1] : vector<16x128xf32> to vector<16xf32>
    %61 = vector.shape_cast %60 : vector<16xf32> to vector<16x1xf32>
    %cst_30 = arith.constant 3.125000e-02 : f32
    %62 = vector.broadcast %cst_30 : f32 to vector<16x1xf32>
    %63 = arith.mulf %61, %62 : vector<16x1xf32>
    %64 = arith.mulf %55, %55 : vector<16x128xf32>
    %cst_31 = arith.constant dense<0.000000e+00> : vector<16xf32>
    %65 = vector.multi_reduction <add>, %64, %cst_31 [1] : vector<16x128xf32> to vector<16xf32>
    %66 = vector.shape_cast %65 : vector<16xf32> to vector<16x1xf32>
    %cst_32 = arith.constant 3.125000e-02 : f32
    %67 = vector.broadcast %cst_32 : f32 to vector<16x1xf32>
    %68 = arith.mulf %66, %67 : vector<16x1xf32>
    %69 = arith.mulf %63, %63 : vector<16x1xf32>
    %70 = arith.subf %68, %69 : vector<16x1xf32>
    %71 = vector.broadcast %63 : vector<16x1xf32> to vector<16x128xf32>
    %72 = arith.subf %55, %71 : vector<16x128xf32>
    %cst_33 = arith.constant 9.99999996E-13 : f32
    %73 = vector.broadcast %cst_33 : f32 to vector<16x1xf32>
    %74 = arith.addf %70, %73 : vector<16x1xf32>
    %75 = math.rsqrt %74 : vector<16x1xf32>
    %76 = vector.broadcast %75 : vector<16x1xf32> to vector<16x128xf32>
    %77 = arith.mulf %72, %76 : vector<16x128xf32>
    %78 = vector.broadcast %57 : vector<1x128xf32> to vector<16x128xf32>
    %79 = arith.mulf %77, %78 : vector<16x128xf32>
    %80 = vector.broadcast %59 : vector<1x128xf32> to vector<16x128xf32>
    %81 = arith.addf %79, %80 : vector<16x128xf32>
    %82 = arith.truncf %81 : vector<16x128xf32> to vector<16x128xbf16>
    %c0_34 = arith.constant 0 : index
    %c160 = arith.constant 160 : index
    %c0_35 = arith.constant 0 : index
    %83 = vector.load %arg2[%c0_34, %c160, %c0_35] : memref<2x416x128xbf16, #tpu.memory_space<vmem>>, vector<1x128x128xbf16>
    %84 = vector.shape_cast %83 : vector<1x128x128xbf16> to vector<128x128xbf16>
    %cst_36 = arith.constant dense<0.000000e+00> : vector<16x128xf32>
    %85 = tpu.matmul %82, %84, %cst_36 {dimension_numbers = #tpu.dot_dimension_numbers<[1], [0], [0], [1], [0, 0, 1, 1], [], []>} : vector<16x128xbf16>, vector<128x128xbf16>, vector<16x128xf32> -> vector<16x128xf32>
    %c0_37 = arith.constant 0 : index
    %c4 = arith.constant 4 : index
    %c0_38 = arith.constant 0 : index
    %86 = vector.load %arg3[%c0_37, %c4, %c0_38] : memref<2x8x128xf32, #tpu.memory_space<vmem>>, vector<1x1x128xf32>
    %87 = vector.shape_cast %86 : vector<1x1x128xf32> to vector<1x128xf32>
    %88 = vector.broadcast %87 : vector<1x128xf32> to vector<16x128xf32>
    %89 = arith.addf %85, %88 : vector<16x128xf32>
    %cst_39 = arith.constant 5.000000e-01 : f32
    %90 = vector.broadcast %cst_39 : f32 to vector<16x128xf32>
    %91 = arith.mulf %90, %89 : vector<16x128xf32>
    %cst_40 = arith.constant 4.471500e-02 : f32
    %92 = vector.broadcast %cst_40 : f32 to vector<16x128xf32>
    %93 = arith.mulf %92, %89 : vector<16x128xf32>
    %94 = arith.mulf %93, %89 : vector<16x128xf32>
    %95 = arith.mulf %94, %89 : vector<16x128xf32>
    %96 = arith.addf %89, %95 : vector<16x128xf32>
    %cst_41 = arith.constant 0.797884583 : f32
    %97 = vector.broadcast %cst_41 : f32 to vector<16x128xf32>
    %98 = arith.mulf %97, %96 : vector<16x128xf32>
    %99 = math.tanh %98 : vector<16x128xf32>
    %cst_42 = arith.constant 1.000000e+00 : f32
    %100 = vector.broadcast %cst_42 : f32 to vector<16x128xf32>
    %101 = arith.addf %100, %99 : vector<16x128xf32>
    %102 = arith.mulf %91, %101 : vector<16x128xf32>
    %103 = arith.truncf %102 : vector<16x128xf32> to vector<16x128xbf16>
    %c0_43 = arith.constant 0 : index
    %c288 = arith.constant 288 : index
    %c0_44 = arith.constant 0 : index
    %104 = vector.load %arg2[%c0_43, %c288, %c0_44] : memref<2x416x128xbf16, #tpu.memory_space<vmem>>, vector<1x128x128xbf16>
    %105 = vector.shape_cast %104 : vector<1x128x128xbf16> to vector<128x128xbf16>
    %cst_45 = arith.constant dense<0.000000e+00> : vector<16x128xf32>
    %106 = tpu.matmul %103, %105, %cst_45 {dimension_numbers = #tpu.dot_dimension_numbers<[1], [0], [0], [1], [0, 0, 1, 1], [], []>} : vector<16x128xbf16>, vector<128x128xbf16>, vector<16x128xf32> -> vector<16x128xf32>
    %c0_46 = arith.constant 0 : index
    %c5 = arith.constant 5 : index
    %c0_47 = arith.constant 0 : index
    %107 = vector.load %arg3[%c0_46, %c5, %c0_47] : memref<2x8x128xf32, #tpu.memory_space<vmem>>, vector<1x1x128xf32>
    %108 = vector.shape_cast %107 : vector<1x1x128xf32> to vector<1x128xf32>
    %109 = vector.broadcast %108 : vector<1x128xf32> to vector<16x128xf32>
    %110 = arith.addf %106, %109 : vector<16x128xf32>
    %111 = arith.addf %81, %110 : vector<16x128xf32>
    %c0_48 = arith.constant 0 : index
    %c6 = arith.constant 6 : index
    %c0_49 = arith.constant 0 : index
    %112 = vector.load %arg3[%c0_48, %c6, %c0_49] : memref<2x8x128xf32, #tpu.memory_space<vmem>>, vector<1x1x128xf32>
    %113 = vector.shape_cast %112 : vector<1x1x128xf32> to vector<1x128xf32>
    %c0_50 = arith.constant 0 : index
    %c7 = arith.constant 7 : index
    %c0_51 = arith.constant 0 : index
    %114 = vector.load %arg3[%c0_50, %c7, %c0_51] : memref<2x8x128xf32, #tpu.memory_space<vmem>>, vector<1x1x128xf32>
    %115 = vector.shape_cast %114 : vector<1x1x128xf32> to vector<1x128xf32>
    %cst_52 = arith.constant dense<0.000000e+00> : vector<16xf32>
    %116 = vector.multi_reduction <add>, %111, %cst_52 [1] : vector<16x128xf32> to vector<16xf32>
    %117 = vector.shape_cast %116 : vector<16xf32> to vector<16x1xf32>
    %cst_53 = arith.constant 3.125000e-02 : f32
    %118 = vector.broadcast %cst_53 : f32 to vector<16x1xf32>
    %119 = arith.mulf %117, %118 : vector<16x1xf32>
    %120 = arith.mulf %111, %111 : vector<16x128xf32>
    %cst_54 = arith.constant dense<0.000000e+00> : vector<16xf32>
    %121 = vector.multi_reduction <add>, %120, %cst_54 [1] : vector<16x128xf32> to vector<16xf32>
    %122 = vector.shape_cast %121 : vector<16xf32> to vector<16x1xf32>
    %cst_55 = arith.constant 3.125000e-02 : f32
    %123 = vector.broadcast %cst_55 : f32 to vector<16x1xf32>
    %124 = arith.mulf %122, %123 : vector<16x1xf32>
    %125 = arith.mulf %119, %119 : vector<16x1xf32>
    %126 = arith.subf %124, %125 : vector<16x1xf32>
    %127 = vector.broadcast %119 : vector<16x1xf32> to vector<16x128xf32>
    %128 = arith.subf %111, %127 : vector<16x128xf32>
    %cst_56 = arith.constant 9.99999996E-13 : f32
    %129 = vector.broadcast %cst_56 : f32 to vector<16x1xf32>
    %130 = arith.addf %126, %129 : vector<16x1xf32>
    %131 = math.rsqrt %130 : vector<16x1xf32>
    %132 = vector.broadcast %131 : vector<16x1xf32> to vector<16x128xf32>
    %133 = arith.mulf %128, %132 : vector<16x128xf32>
    %134 = vector.broadcast %113 : vector<1x128xf32> to vector<16x128xf32>
    %135 = arith.mulf %133, %134 : vector<16x128xf32>
    %136 = vector.broadcast %115 : vector<1x128xf32> to vector<16x128xf32>
    %137 = arith.addf %135, %136 : vector<16x128xf32>
    %c0_57 = arith.constant 0 : index
    %c0_58 = arith.constant 0 : index
    %c0_59 = arith.constant 0 : index
    %138 = vector.load %arg4[%c0_57, %c0_58, %c0_59] : memref<2x16x128xf32, #tpu.memory_space<vmem>>, vector<1x16x128xf32>
    %139 = vector.shape_cast %138 : vector<1x16x128xf32> to vector<16x128xf32>
    %140 = vector.shape_cast %137 : vector<16x128xf32> to vector<1x16x128xf32>
    tpu.vector_store %arg4[%c0_57, %c0_58, %c0_59], %140 {strides = array<i32>} : memref<2x16x128xf32, #tpu.memory_space<vmem>>, vector<1x16x128xf32>,
    %141 = arith.truncf %137 : vector<16x128xf32> to vector<16x128xbf16>
    %c1_60 = arith.constant 1 : index
    %c0_61 = arith.constant 0 : index
    %c0_62 = arith.constant 0 : index
    %142 = vector.load %arg2[%c1_60, %c0_61, %c0_62] : memref<2x416x128xbf16, #tpu.memory_space<vmem>>, vector<1x128x128xbf16>
    %143 = vector.shape_cast %142 : vector<1x128x128xbf16> to vector<128x128xbf16>
    %cst_63 = arith.constant dense<0.000000e+00> : vector<16x128xf32>
    %144 = tpu.matmul %141, %143, %cst_63 {dimension_numbers = #tpu.dot_dimension_numbers<[1], [0], [0], [1], [0, 0, 1, 1], [], []>} : vector<16x128xbf16>, vector<128x128xbf16>, vector<16x128xf32> -> vector<16x128xf32>
    %c1_64 = arith.constant 1 : index
    %c0_65 = arith.constant 0 : index
    %c0_66 = arith.constant 0 : index
    %145 = vector.load %arg3[%c1_64, %c0_65, %c0_66] : memref<2x8x128xf32, #tpu.memory_space<vmem>>, vector<1x1x128xf32>
    %146 = vector.shape_cast %145 : vector<1x1x128xf32> to vector<1x128xf32>
    %147 = vector.broadcast %146 : vector<1x128xf32> to vector<16x128xf32>
    %148 = arith.addf %144, %147 : vector<16x128xf32>
    %149 = vector.extract_strided_slice %148 {offsets = [0, 0], sizes = [16, 16], strides = [1, 1]} : vector<16x128xf32> to vector<16x16xf32>
    %150 = vector.extract_strided_slice %148 {offsets = [0, 32], sizes = [16, 16], strides = [1, 1]} : vector<16x128xf32> to vector<16x16xf32>
    %151 = vector.extract_strided_slice %148 {offsets = [0, 64], sizes = [16, 16], strides = [1, 1]} : vector<16x128xf32> to vector<16x16xf32>
    "tpu.trace_start"() <{level = 10 : i32, message = "qd,kd->qk"}> : () -> ()
    %cst_67 = arith.constant dense<0.000000e+00> : vector<16x16xf32>
    %152 = tpu.matmul %149, %150, %cst_67 {dimension_numbers = #tpu.dot_dimension_numbers<[1], [1], [0], [0], [0, 0, 1, 0], [], []>} : vector<16x16xf32>, vector<16x16xf32>, vector<16x16xf32> -> vector<16x16xf32>
    "tpu.trace_stop"() : () -> ()
    %153 = arith.addf %152, %1 : vector<16x16xf32>
    %cst_68 = arith.constant dense<0xFF800000> : vector<16xf32>
    %154 = vector.multi_reduction <maximumf>, %153, %cst_68 [1] : vector<16x16xf32> to vector<16xf32>
    %155 = vector.shape_cast %154 : vector<16xf32> to vector<16x1xf32>
    %156 = vector.broadcast %155 : vector<16x1xf32> to vector<16x16xf32>
    %157 = arith.subf %153, %156 : vector<16x16xf32>
    %158 = math.exp %157 : vector<16x16xf32>
    %cst_69 = arith.constant dense<0.000000e+00> : vector<16xf32>
    %159 = vector.multi_reduction <add>, %158, %cst_69 [1] : vector<16x16xf32> to vector<16xf32>
    %160 = vector.shape_cast %159 : vector<16xf32> to vector<16x1xf32>
    %161 = tpu.reciprocal %160 {approx = true} : vector<16x1xf32> -> vector<16x1xf32>
    %162 = vector.broadcast %161 : vector<16x1xf32> to vector<16x16xf32>
    %163 = arith.mulf %158, %162 : vector<16x16xf32>
    %cst_70 = arith.constant dense<0.000000e+00> : vector<16x16xf32>
    %164 = tpu.matmul %163, %151, %cst_70 {dimension_numbers = #tpu.dot_dimension_numbers<[1], [0], [0], [1], [0, 0, 1, 1], [], []>} : vector<16x16xf32>, vector<16x16xf32>, vector<16x16xf32> -> vector<16x16xf32>
    %165 = arith.truncf %164 : vector<16x16xf32> to vector<16x16xbf16>
    %c1_71 = arith.constant 1 : index
    %c128_72 = arith.constant 128 : index
    %c0_73 = arith.constant 0 : index
    %166 = vector.load %arg2[%c1_71, %c128_72, %c0_73] : memref<2x416x128xbf16, #tpu.memory_space<vmem>>, vector<1x16x128xbf16>
    %167 = vector.shape_cast %166 : vector<1x16x128xbf16> to vector<16x128xbf16>
    %cst_74 = arith.constant dense<0.000000e+00> : vector<16x128xf32>
    %168 = tpu.matmul %165, %167, %cst_74 {dimension_numbers = #tpu.dot_dimension_numbers<[1], [0], [0], [1], [0, 0, 1, 1], [], []>} : vector<16x16xbf16>, vector<16x128xbf16>, vector<16x128xf32> -> vector<16x128xf32>
    %169 = vector.extract_strided_slice %148 {offsets = [0, 16], sizes = [16, 16], strides = [1, 1]} : vector<16x128xf32> to vector<16x16xf32>
    %170 = vector.extract_strided_slice %148 {offsets = [0, 48], sizes = [16, 16], strides = [1, 1]} : vector<16x128xf32> to vector<16x16xf32>
    %171 = vector.extract_strided_slice %148 {offsets = [0, 80], sizes = [16, 16], strides = [1, 1]} : vector<16x128xf32> to vector<16x16xf32>
    "tpu.trace_start"() <{level = 10 : i32, message = "qd,kd->qk"}> : () -> ()
    %cst_75 = arith.constant dense<0.000000e+00> : vector<16x16xf32>
    %172 = tpu.matmul %169, %170, %cst_75 {dimension_numbers = #tpu.dot_dimension_numbers<[1], [1], [0], [0], [0, 0, 1, 0], [], []>} : vector<16x16xf32>, vector<16x16xf32>, vector<16x16xf32> -> vector<16x16xf32>
    "tpu.trace_stop"() : () -> ()
    %173 = arith.addf %172, %1 : vector<16x16xf32>
    %cst_76 = arith.constant dense<0xFF800000> : vector<16xf32>
    %174 = vector.multi_reduction <maximumf>, %173, %cst_76 [1] : vector<16x16xf32> to vector<16xf32>
    %175 = vector.shape_cast %174 : vector<16xf32> to vector<16x1xf32>
    %176 = vector.broadcast %175 : vector<16x1xf32> to vector<16x16xf32>
    %177 = arith.subf %173, %176 : vector<16x16xf32>
    %178 = math.exp %177 : vector<16x16xf32>
    %cst_77 = arith.constant dense<0.000000e+00> : vector<16xf32>
    %179 = vector.multi_reduction <add>, %178, %cst_77 [1] : vector<16x16xf32> to vector<16xf32>
    %180 = vector.shape_cast %179 : vector<16xf32> to vector<16x1xf32>
    %181 = tpu.reciprocal %180 {approx = true} : vector<16x1xf32> -> vector<16x1xf32>
    %182 = vector.broadcast %181 : vector<16x1xf32> to vector<16x16xf32>
    %183 = arith.mulf %178, %182 : vector<16x16xf32>
    %cst_78 = arith.constant dense<0.000000e+00> : vector<16x16xf32>
    %184 = tpu.matmul %183, %171, %cst_78 {dimension_numbers = #tpu.dot_dimension_numbers<[1], [0], [0], [1], [0, 0, 1, 1], [], []>} : vector<16x16xf32>, vector<16x16xf32>, vector<16x16xf32> -> vector<16x16xf32>
    %185 = arith.truncf %184 : vector<16x16xf32> to vector<16x16xbf16>
    %c1_79 = arith.constant 1 : index
    %c144_80 = arith.constant 144 : index
    %c0_81 = arith.constant 0 : index
    %186 = vector.load %arg2[%c1_79, %c144_80, %c0_81] : memref<2x416x128xbf16, #tpu.memory_space<vmem>>, vector<1x16x128xbf16>
    %187 = vector.shape_cast %186 : vector<1x16x128xbf16> to vector<16x128xbf16>
    %cst_82 = arith.constant dense<0.000000e+00> : vector<16x128xf32>
    %188 = tpu.matmul %185, %187, %cst_82 {dimension_numbers = #tpu.dot_dimension_numbers<[1], [0], [0], [1], [0, 0, 1, 1], [], []>} : vector<16x16xbf16>, vector<16x128xbf16>, vector<16x128xf32> -> vector<16x128xf32>
    %189 = arith.addf %168, %188 : vector<16x128xf32>
    %c1_83 = arith.constant 1 : index
    %c1_84 = arith.constant 1 : index
    %c0_85 = arith.constant 0 : index
    %190 = vector.load %arg3[%c1_83, %c1_84, %c0_85] : memref<2x8x128xf32, #tpu.memory_space<vmem>>, vector<1x1x128xf32>
    %191 = vector.shape_cast %190 : vector<1x1x128xf32> to vector<1x128xf32>
    %192 = vector.broadcast %191 : vector<1x128xf32> to vector<16x128xf32>
    %193 = arith.addf %189, %192 : vector<16x128xf32>
    %194 = arith.addf %137, %193 : vector<16x128xf32>
    %c1_86 = arith.constant 1 : index
    %c2_87 = arith.constant 2 : index
    %c0_88 = arith.constant 0 : index
    %195 = vector.load %arg3[%c1_86, %c2_87, %c0_88] : memref<2x8x128xf32, #tpu.memory_space<vmem>>, vector<1x1x128xf32>
    %196 = vector.shape_cast %195 : vector<1x1x128xf32> to vector<1x128xf32>
    %c1_89 = arith.constant 1 : index
    %c3_90 = arith.constant 3 : index
    %c0_91 = arith.constant 0 : index
    %197 = vector.load %arg3[%c1_89, %c3_90, %c0_91] : memref<2x8x128xf32, #tpu.memory_space<vmem>>, vector<1x1x128xf32>
    %198 = vector.shape_cast %197 : vector<1x1x128xf32> to vector<1x128xf32>
    %cst_92 = arith.constant dense<0.000000e+00> : vector<16xf32>
    %199 = vector.multi_reduction <add>, %194, %cst_92 [1] : vector<16x128xf32> to vector<16xf32>
    %200 = vector.shape_cast %199 : vector<16xf32> to vector<16x1xf32>
    %cst_93 = arith.constant 3.125000e-02 : f32
    %201 = vector.broadcast %cst_93 : f32 to vector<16x1xf32>
    %202 = arith.mulf %200, %201 : vector<16x1xf32>
    %203 = arith.mulf %194, %194 : vector<16x128xf32>
    %cst_94 = arith.constant dense<0.000000e+00> : vector<16xf32>
    %204 = vector.multi_reduction <add>, %203, %cst_94 [1] : vector<16x128xf32> to vector<16xf32>
    %205 = vector.shape_cast %204 : vector<16xf32> to vector<16x1xf32>
    %cst_95 = arith.constant 3.125000e-02 : f32
    %206 = vector.broadcast %cst_95 : f32 to vector<16x1xf32>
    %207 = arith.mulf %205, %206 : vector<16x1xf32>
    %208 = arith.mulf %202, %202 : vector<16x1xf32>
    %209 = arith.subf %207, %208 : vector<16x1xf32>
    %210 = vector.broadcast %202 : vector<16x1xf32> to vector<16x128xf32>
    %211 = arith.subf %194, %210 : vector<16x128xf32>
    %cst_96 = arith.constant 9.99999996E-13 : f32
    %212 = vector.broadcast %cst_96 : f32 to vector<16x1xf32>
    %213 = arith.addf %209, %212 : vector<16x1xf32>
    %214 = math.rsqrt %213 : vector<16x1xf32>
    %215 = vector.broadcast %214 : vector<16x1xf32> to vector<16x128xf32>
    %216 = arith.mulf %211, %215 : vector<16x128xf32>
    %217 = vector.broadcast %196 : vector<1x128xf32> to vector<16x128xf32>
    %218 = arith.mulf %216, %217 : vector<16x128xf32>
    %219 = vector.broadcast %198 : vector<1x128xf32> to vector<16x128xf32>
    %220 = arith.addf %218, %219 : vector<16x128xf32>
    %221 = arith.truncf %220 : vector<16x128xf32> to vector<16x128xbf16>
    %c1_97 = arith.constant 1 : index
    %c160_98 = arith.constant 160 : index
    %c0_99 = arith.constant 0 : index
    %222 = vector.load %arg2[%c1_97, %c160_98, %c0_99] : memref<2x416x128xbf16, #tpu.memory_space<vmem>>, vector<1x128x128xbf16>
    %223 = vector.shape_cast %222 : vector<1x128x128xbf16> to vector<128x128xbf16>
    %cst_100 = arith.constant dense<0.000000e+00> : vector<16x128xf32>
    %224 = tpu.matmul %221, %223, %cst_100 {dimension_numbers = #tpu.dot_dimension_numbers<[1], [0], [0], [1], [0, 0, 1, 1], [], []>} : vector<16x128xbf16>, vector<128x128xbf16>, vector<16x128xf32> -> vector<16x128xf32>
    %c1_101 = arith.constant 1 : index
    %c4_102 = arith.constant 4 : index
    %c0_103 = arith.constant 0 : index
    %225 = vector.load %arg3[%c1_101, %c4_102, %c0_103] : memref<2x8x128xf32, #tpu.memory_space<vmem>>, vector<1x1x128xf32>
    %226 = vector.shape_cast %225 : vector<1x1x128xf32> to vector<1x128xf32>
    %227 = vector.broadcast %226 : vector<1x128xf32> to vector<16x128xf32>
    %228 = arith.addf %224, %227 : vector<16x128xf32>
    %cst_104 = arith.constant 5.000000e-01 : f32
    %229 = vector.broadcast %cst_104 : f32 to vector<16x128xf32>
    %230 = arith.mulf %229, %228 : vector<16x128xf32>
    %cst_105 = arith.constant 4.471500e-02 : f32
    %231 = vector.broadcast %cst_105 : f32 to vector<16x128xf32>
    %232 = arith.mulf %231, %228 : vector<16x128xf32>
    %233 = arith.mulf %232, %228 : vector<16x128xf32>
    %234 = arith.mulf %233, %228 : vector<16x128xf32>
    %235 = arith.addf %228, %234 : vector<16x128xf32>
    %cst_106 = arith.constant 0.797884583 : f32
    %236 = vector.broadcast %cst_106 : f32 to vector<16x128xf32>
    %237 = arith.mulf %236, %235 : vector<16x128xf32>
    %238 = math.tanh %237 : vector<16x128xf32>
    %cst_107 = arith.constant 1.000000e+00 : f32
    %239 = vector.broadcast %cst_107 : f32 to vector<16x128xf32>
    %240 = arith.addf %239, %238 : vector<16x128xf32>
    %241 = arith.mulf %230, %240 : vector<16x128xf32>
    %242 = arith.truncf %241 : vector<16x128xf32> to vector<16x128xbf16>
    %c1_108 = arith.constant 1 : index
    %c288_109 = arith.constant 288 : index
    %c0_110 = arith.constant 0 : index
    %243 = vector.load %arg2[%c1_108, %c288_109, %c0_110] : memref<2x416x128xbf16, #tpu.memory_space<vmem>>, vector<1x128x128xbf16>
    %244 = vector.shape_cast %243 : vector<1x128x128xbf16> to vector<128x128xbf16>
    %cst_111 = arith.constant dense<0.000000e+00> : vector<16x128xf32>
    %245 = tpu.matmul %242, %244, %cst_111 {dimension_numbers = #tpu.dot_dimension_numbers<[1], [0], [0], [1], [0, 0, 1, 1], [], []>} : vector<16x128xbf16>, vector<128x128xbf16>, vector<16x128xf32> -> vector<16x128xf32>
    %c1_112 = arith.constant 1 : index
    %c5_113 = arith.constant 5 : index
    %c0_114 = arith.constant 0 : index
    %246 = vector.load %arg3[%c1_112, %c5_113, %c0_114] : memref<2x8x128xf32, #tpu.memory_space<vmem>>, vector<1x1x128xf32>
    %247 = vector.shape_cast %246 : vector<1x1x128xf32> to vector<1x128xf32>
    %248 = vector.broadcast %247 : vector<1x128xf32> to vector<16x128xf32>
    %249 = arith.addf %245, %248 : vector<16x128xf32>
    %250 = arith.addf %220, %249 : vector<16x128xf32>
    %c1_115 = arith.constant 1 : index
    %c6_116 = arith.constant 6 : index
    %c0_117 = arith.constant 0 : index
    %251 = vector.load %arg3[%c1_115, %c6_116, %c0_117] : memref<2x8x128xf32, #tpu.memory_space<vmem>>, vector<1x1x128xf32>
    %252 = vector.shape_cast %251 : vector<1x1x128xf32> to vector<1x128xf32>
    %c1_118 = arith.constant 1 : index
    %c7_119 = arith.constant 7 : index
    %c0_120 = arith.constant 0 : index
    %253 = vector.load %arg3[%c1_118, %c7_119, %c0_120] : memref<2x8x128xf32, #tpu.memory_space<vmem>>, vector<1x1x128xf32>
    %254 = vector.shape_cast %253 : vector<1x1x128xf32> to vector<1x128xf32>
    %cst_121 = arith.constant dense<0.000000e+00> : vector<16xf32>
    %255 = vector.multi_reduction <add>, %250, %cst_121 [1] : vector<16x128xf32> to vector<16xf32>
    %256 = vector.shape_cast %255 : vector<16xf32> to vector<16x1xf32>
    %cst_122 = arith.constant 3.125000e-02 : f32
    %257 = vector.broadcast %cst_122 : f32 to vector<16x1xf32>
    %258 = arith.mulf %256, %257 : vector<16x1xf32>
    %259 = arith.mulf %250, %250 : vector<16x128xf32>
    %cst_123 = arith.constant dense<0.000000e+00> : vector<16xf32>
    %260 = vector.multi_reduction <add>, %259, %cst_123 [1] : vector<16x128xf32> to vector<16xf32>
    %261 = vector.shape_cast %260 : vector<16xf32> to vector<16x1xf32>
    %cst_124 = arith.constant 3.125000e-02 : f32
    %262 = vector.broadcast %cst_124 : f32 to vector<16x1xf32>
    %263 = arith.mulf %261, %262 : vector<16x1xf32>
    %264 = arith.mulf %258, %258 : vector<16x1xf32>
    %265 = arith.subf %263, %264 : vector<16x1xf32>
    %266 = vector.broadcast %258 : vector<16x1xf32> to vector<16x128xf32>
    %267 = arith.subf %250, %266 : vector<16x128xf32>
    %cst_125 = arith.constant 9.99999996E-13 : f32
    %268 = vector.broadcast %cst_125 : f32 to vector<16x1xf32>
    %269 = arith.addf %265, %268 : vector<16x1xf32>
    %270 = math.rsqrt %269 : vector<16x1xf32>
    %271 = vector.broadcast %270 : vector<16x1xf32> to vector<16x128xf32>
    %272 = arith.mulf %267, %271 : vector<16x128xf32>
    %273 = vector.broadcast %252 : vector<1x128xf32> to vector<16x128xf32>
    %274 = arith.mulf %272, %273 : vector<16x128xf32>
    %275 = vector.broadcast %254 : vector<1x128xf32> to vector<16x128xf32>
    %276 = arith.addf %274, %275 : vector<16x128xf32>
    %c1_126 = arith.constant 1 : index
    %c0_127 = arith.constant 0 : index
    %c0_128 = arith.constant 0 : index
    %277 = vector.load %arg4[%c1_126, %c0_127, %c0_128] : memref<2x16x128xf32, #tpu.memory_space<vmem>>, vector<1x16x128xf32>
    %278 = vector.shape_cast %277 : vector<1x16x128xf32> to vector<16x128xf32>
    %279 = vector.shape_cast %276 : vector<16x128xf32> to vector<1x16x128xf32>
    tpu.vector_store %arg4[%c1_126, %c0_127, %c0_128], %279 {strides = array<i32>} : memref<2x16x128xf32, #tpu.memory_space<vmem>>, vector<1x16x128xf32>,
    return
  }
}

</mosaic_0001>

<bundles_post_ra>
// kernel: encoder_forward.1
= control target key start
LH: loop header
LB: loop body
LE: loop exit
PB: predicated region body
PF: predicated region fallthrough
CT: control target
= control target key end

     0   :  { %v2573_v0 = vmov 0.0   ;;  %vm2574_vm0 = vmmov 0   ;;  %vm139_vm1 = vcmask 130048   ;;  %s2576_s15 = smov 64   ;;  %s2577_s16 = smov 80   ;;  %s3025_s2 = inlined_call_operand.vmem [shape: bf16[2,416,128], index: 2, kind: input, shape index: {}]   ;;  %s3026_s0 = inlined_call_operand.vmem [shape: f32[16,128], index: 0, kind: input, shape index: {}]   ;;  %s3027_s3 = inlined_call_operand.vmem [shape: f32[2,8,128], index: 3, kind: input, shape index: {}]   ;;  %s3028_s1 = inlined_call_operand.vmem [shape: f32[16,16], index: 1, kind: input, shape index: {}]   ;;  %s3029_s4 = inlined_call_operand.vmem [shape: f32[2,16,128], index: 4, kind: output, shape index: {}]  }
   0x1   :  { %2178 = vmatprep.subr.bf16.mxu0 %v2573_v0  ;;  %v2465_v1 = vld [vmem:[%s3025_s2] sm:$0xff]   ;;  %2194 = vmatprep.mubr.msk.bf16.mxu0 %vm2574_vm0, %v2573_v0  ;;  %v2466_v2 = vld [vmem:[%s3025_s2 + $0x8] sm:$0xff]   ;;  %v2467_v3 = vld [vmem:[%s3025_s2 + $0x10] sm:$0xff]   ;;  %s2579_s17 = smov 48  }
   0x2   :  { %2179 = vmatpush3.bf16.msra.mxu0 %v2465_v1  ;;  %v2468_v4 = vld [vmem:[%s3025_s2 + $0x18] sm:$0xff]   ;;  %v2469_v5 = vld [vmem:[%s3025_s2 + $0x20] sm:$0xff]   ;;  %v2470_v6 = vld [vmem:[%s3025_s2 + $0x28] sm:$0xff]  }
   0x3   :  { %2180 = vmatprep.subr.bf16.mxu0 %v2573_v0  ;;  %v2471_v7 = vld [vmem:[%s3025_s2 + $0x30] sm:$0xff]   ;;  %v2472_v8 = vld [vmem:[%s3025_s2 + $0x38] sm:$0xff]   ;;  %v2641_v9 = vld [vmem:[%s3026_s0] sm:$0xff] }
   0x4   :  { %v2646_v10 = vld [vmem:[%s3026_s0 + $0x8] sm:$0xff]  ;;  %v1926_v12 = vld [vmem:[%s3027_s3] ss:$0 sm:$0xff]  ;;  %s2575_s0 = smov 96   ;;  %vm2664_vm2 = vmpackc.low %vm139_vm1, %vm139_vm1 }
   0x5   :  { %v22_v11 = vpack.c.bf16 %v2646_v10, %v2641_v9  ;;  %v2676_v25 = vld [vmem:[%s3028_s1 + $0x8] sm:$0xff]  ;;  %v2681_v26 = vld [vmem:[%s3028_s1] sm:$0xff]  ;;  %s2578_s1 = smov 112  }
   0x6   :  { %2181 = vmatpush3.bf16.msra.mxu0 %v2466_v2 }
   0x7   :  { %2182 = vmatprep.subr.bf16.mxu0 %v2573_v0 }
   0xa   :  { %2183 = vmatpush3.bf16.msra.mxu0 %v2467_v3 }
   0xb   :  { %2184 = vmatprep.subr.bf16.mxu0 %v2573_v0 }
   0xe   :  { %2185 = vmatpush3.bf16.msra.mxu0 %v2468_v4 }
   0xf   :  { %2186 = vmatprep.subr.bf16.mxu0 %v2573_v0 }
  0x12   :  { %2187 = vmatpush3.bf16.msra.mxu0 %v2469_v5 }
  0x13   :  { %2188 = vmatprep.subr.bf16.mxu0 %v2573_v0 }
  0x16   :  { %2189 = vmatpush3.bf16.msra.mxu0 %v2470_v6 }
  0x17   :  { %2190 = vmatprep.subr.bf16.mxu0 %v2573_v0 }
  0x1a   :  { %2191 = vmatpush3.bf16.msra.mxu0 %v2471_v7 }
  0x1b   :  { %2192 = vmatprep.subr.bf16.mxu0 %v2573_v0 }
  0x1e   :  { %2193 = vmatpush3.bf16.msra.mxu0 %v2472_v8 }
  0x1f   :  { %2238 = vmatprep.subr.bf16.mxu0 %v2573_v0 }
  0x21   :  { %2195 = vmatmul.mubr.bf16.vlgmr.msra.gmra.mrb[0].mxu0 %v22_v11 }
  0x22   :  { %2254 = vmatprep.mubr.msk.bf16.mxu0 %vm2574_vm0, %v2573_v0 }
  0xf4   :  { %v126_v13 = vpop.f32.mrb[0].mxu0 }
  0xf5   :  { %v127_v14 = vadd.f32 %v1926_v12, %v126_v13  ;;  %v2196_v15 = vpop.f32.mrb[1].mxu0 }
  0xf6   :  { %v129_v16 = vpop.f32.mrb[2].mxu0 }
  0xf7   :  { %v130_v17 = vadd.f32 %v1926_v12, %v129_v16  ;;  %v2197_v18 = vpop.f32.mrb[3].mxu0  ;;  %2202 = vmatprep.mubr.msk.f32.mxu1 %vm139_vm1, %v127_v14 }
  0xf9   :  { %v2658_v19 = vpack.i.bf16 %v130_v17, %v127_v14 }
  0xfb   :  { %2426 = vrot.lane.b32.xlu0 %v2658_v19, %s2575_s0 }
 0x16d   :  { %v2427_v20 = vpop.permute.xlu0 %2426 }
 0x16e   :  { %v2429_v21 = vunpack.i.h.bf16 %v2427_v20  ;;  %v2428_v22 = vunpack.i.l.bf16 %v2427_v20 }
 0x170   :  { %v2378_v24 = vpack.c.bf16 %v2429_v21, %v2428_v22 }
 0x172   :  { %2380 = vmatprep.subr.msk.bf16.mxu1 %vm2664_vm2, %v2378_v24 }
 0x173   :  { %2383 = vmatpush3.bf16.xpose.msk.msra.mxu1 %vm2664_vm2, %v2378_v24 }
 0x17a   :  { %2203 = vmatmul.mubr.msk.f32.vlgmr.msra.gmra.mrb[0].mxu1 %vm139_vm1, %v130_v17 }
 0x24d   :  { %v2204_v27 = vpop.f32.mrb[0].mxu1 }
 0x24e   :  { %v220_v28 = vadd.f32 %v2204_v27, %v2676_v25  ;;  %v214_v29 = vpop.f32.mrb[1].mxu1 }
 0x24f   :  { %v215_v30 = vadd.f32 %v214_v29, %v2681_v26 }
 0x250   :  { %v226_v31 = vsel %vm139_vm1, %v220_v28, -inf }
 0x251   :  { %227 = vmax.xlane.f32.xlu1 %v226_v31  ;;  %v223_v32 = vsel %vm139_vm1, %v215_v30, -inf }
 0x252   :  { %224 = vmax.xlane.f32.xlu0 %v223_v32 }
 0x262   :  { %2431 = vrot.lane.b32.xlu1 %v2658_v19, %s2576_s15 }
 0x266   :  { %2436 = vrot.lane.b32.xlu1 %v2658_v19, %s2577_s16 }
 0x268   :  { %337 = vrot.lane.b32.xlu0 %v130_v17, %s2578_s1 }
 0x2de   :  { %v228_v33 = vpop.xlane.xlu1 %227 }
 0x2df   :  { %v230_v34 = vsub.f32 %v220_v28, %v228_v33  ;;  %v225_v35 = vpop.xlane.xlu0 %224  ;;  %v2474_v33 = vld [vmem:[%s3025_s2 + $0x40] sm:$0xff]  }
 0x2e0   :  { %v229_v36 = vsub.f32 %v215_v30, %v225_v35 }
 0x2e1   :  { %v233_v37 = vmul.f32 1.442695, %v230_v34 }
 0x2e2   :  { %v231_v38 = vmul.f32 1.442695, %v229_v36  ;;  %v2432_v39 = vpop.permute.xlu1 %2431 }
 0x2e3   :  { %2517 = vpow2.f32 %v233_v37  ;;  %v2434_v40 = vunpack.i.h.bf16 %v2432_v39  ;;  %v2433_v41 = vunpack.i.l.bf16 %v2432_v39  ;;  %v338_v58 = vpop.permute.xlu0 %337 }
 0x2e4   :  { %2519 = vpow2.f32 %v231_v38 }
 0x2e5   :  { %v2384_v42 = vpack.c.bf16 %v2434_v40, %v2433_v41  ;;  %v1951_v40 = vld [vmem:[%s3027_s3 + $0x1] ss:$0 sm:$0xff] }
 0x2e6   :  { %v2437_v43 = vpop.permute.xlu1 %2436 }
 0x2e7   :  { %v2439_v44 = vunpack.i.h.bf16 %v2437_v43  ;;  %v2438_v45 = vunpack.i.l.bf16 %v2437_v43  ;;  %2385 = vmatprep.subr.bf16.mxu1 %v2384_v42 }
 0x2e8   :  { %2387 = vmatpush3.bf16.msra.mxu1 %v2384_v42 }
 0x2e9   :  { %v2388_v46 = vpack.c.bf16 %v2439_v44, %v2438_v45 }
 0x2eb   :  { %2390 = vmatprep.subr.msk.bf16.mxu1 %vm2664_vm2, %v2388_v46 }
 0x2ed   :  { %v2518_v47 = vpop.eup %2517 }
 0x2ee   :  { %v238_v48 = vsel %vm139_vm1, %v2518_v47, 0.0  ;;  %v2520_v49 = vpop.eup %2519 }
 0x2ef   :  { %239 = vadd.xlane.f32.xlu1 %v238_v48  ;;  %v235_v50 = vsel %vm139_vm1, %v2520_v49, 0.0 }
 0x2f3   :  { %236 = vadd.xlane.f32.xlu1 %v235_v50 }
 0x304   :  { %335 = vrot.lane.b32.xlu1 %v127_v14, %s2578_s1 }
 0x37c   :  { %v240_v51 = vpop.xlane.xlu1 %239 }
 0x37d   :  { %2521 = vrcp.f32 %v240_v51 }
 0x380   :  { %v237_v52 = vpop.xlane.xlu1 %236 }
 0x381   :  { %2523 = vrcp.f32 %v237_v52  ;;  %v2475_v52 = vld [vmem:[%s3025_s2 + $0x50] sm:$0xff]  }
 0x382   :  { %2239 = vmatpush3.bf16.msra.mxu0 %v2475_v52 }
 0x383   :  { %2240 = vmatprep.subr.bf16.mxu0 %v2573_v0 }
 0x384   :  { %v336_v57 = vpop.permute.xlu1 %335 }
 0x387   :  { %v2522_v53 = vpop.eup %2521 }
 0x388   :  { %v244_v56 = vmul.f32 %v2522_v53, %v2518_v47  ;;  %v2476_v53 = vld [vmem:[%s3025_s2 + $0x58] sm:$0xff]  }
 0x389   :  { %2241 = vmatpush3.bf16.msra.mxu0 %v2476_v53 }
 0x38a   :  { %2242 = vmatprep.subr.bf16.mxu0 %v2573_v0 }
 0x38b   :  { %v2524_v54 = vpop.eup %2523 }
 0x38c   :  { %v243_v55 = vmul.f32 %v2524_v54, %v2520_v49  ;;  %v2479_v54 = vld [vmem:[%s3025_s2 + $0x70] sm:$0xff]  }
 0x38e   :  { %2209 = vmatprep.mubr.msk.f32.mxu1 %vm139_vm1, %v243_v55  ;;  %v2480_v55 = vld [vmem:[%s3025_s2 + $0x78] sm:$0xff]  }
 0x38f   :  { %2210 = vmatmul.mubr.msk.f32.vlgmr.msra.gmra.mrb[2].mxu1 %vm139_vm1, %v244_v56  ;;  %v2481_v56 = vld [vmem:[%s3025_s2 + $0x80] sm:$0xff]  }
 0x390   :  { %2393 = vmatpush3.bf16.xpose.msk.msra.mxu1 %vm2664_vm2, %v2388_v46  ;;  %2216 = vmatprep.mubr.msk.f32.mxu1 %vm139_vm1, %v336_v57  ;;  %v2482_v57 = vld [vmem:[%s3025_s2 + $0x88] sm:$0xff]  }
 0x397   :  { %2217 = vmatmul.mubr.msk.f32.vlgmr.msra.gmra.mrb[4].mxu1 %vm139_vm1, %v338_v58 }
 0x462   :  { %v2211_v59 = vpop.f32.mrb[2].mxu1 }
 0x463   :  { %v323_v60 = vpop.f32.mrb[3].mxu1 }
 0x464   :  { %v332_v61 = vpack.c.bf16 %v2211_v59, %v323_v60 }
 0x46a   :  { %v2218_v62 = vpop.f32.mrb[4].mxu1 }
 0x46b   :  { %v423_v63 = vadd.f32 %v2218_v62, %v2676_v25  ;;  %v417_v1 = vpop.f32.mrb[5].mxu1 }
 0x46c   :  { %v418_v2 = vadd.f32 %v417_v1, %v2681_v26 }
 0x46d   :  { %v429_v3 = vsel %vm139_vm1, %v423_v63, -inf }
 0x46e   :  { %430 = vmax.xlane.f32.xlu0 %v429_v3  ;;  %v426_v4 = vsel %vm139_vm1, %v418_v2, -inf }
 0x46f   :  { %427 = vmax.xlane.f32.xlu1 %v426_v4 }
 0x4fb   :  { %v431_v5 = vpop.xlane.xlu0 %430 }
 0x4fc   :  { %v433_v6 = vsub.f32 %v423_v63, %v431_v5  ;;  %v428_v7 = vpop.xlane.xlu1 %427 }
 0x4fd   :  { %v432_v8 = vsub.f32 %v418_v2, %v428_v7 }
 0x4fe   :  { %v436_v11 = vmul.f32 1.442695, %v433_v6 }
 0x4ff   :  { %v434_v12 = vmul.f32 1.442695, %v432_v8 }
 0x500   :  { %2525 = vpow2.f32 %v436_v11 }
 0x501   :  { %2527 = vpow2.f32 %v434_v12 }
 0x50a   :  { %v2526_v13 = vpop.eup %2525 }
 0x50b   :  { %v441_v14 = vsel %vm139_vm1, %v2526_v13, 0.0  ;;  %v2528_v15 = vpop.eup %2527 }
 0x50c   :  { %442 = vadd.xlane.f32.xlu1 %v441_v14  ;;  %v438_v16 = vsel %vm139_vm1, %v2528_v15, 0.0 }
 0x510   :  { %439 = vadd.xlane.f32.xlu1 %v438_v16 }
 0x521   :  { %2441 = vrot.lane.b32.xlu1 %v2658_v19, %s2579_s17  ;;  %v2473_v19 = vld [vmem:[%s3025_s2 + $0x48] sm:$0xff]  }
 0x599   :  { %v443_v17 = vpop.xlane.xlu1 %442 }
 0x59a   :  { %2529 = vrcp.f32 %v443_v17 }
 0x59d   :  { %v440_v18 = vpop.xlane.xlu1 %439 }
 0x59e   :  { %2531 = vrcp.f32 %v440_v18 }
 0x5a1   :  { %v2442_v20 = vpop.permute.xlu1 %2441 }
 0x5a2   :  { %v2444_v21 = vunpack.i.h.bf16 %v2442_v20  ;;  %v2443_v22 = vunpack.i.l.bf16 %v2442_v20  ;;  %v1953_v20 = vld [vmem:[%s3027_s3 + $0x3] ss:$0 sm:$0xff] }
 0x5a4   :  { %v2394_v24 = vpack.c.bf16 %v2444_v21, %v2443_v22  ;;  %v2530_v27 = vpop.eup %2529 }
 0x5a5   :  { %v447_v30 = vmul.f32 %v2530_v27, %v2526_v13  ;;  %v1952_v13 = vld [vmem:[%s3027_s3 + $0x2] ss:$0 sm:$0xff] }
 0x5a6   :  { %2395 = vmatprep.subr.bf16.mxu1 %v2394_v24 }
 0x5a7   :  { %2397 = vmatpush3.bf16.msra.mxu1 %v2394_v24 }
 0x5a8   :  { %v2532_v28 = vpop.eup %2531  ;;  %2226 = vmatprep.subr.bf16.mxu1 %v2573_v0 }
 0x5a9   :  { %v446_v29 = vmul.f32 %v2532_v28, %v2528_v15  ;;  %v2483_v28 = vld [vmem:[%s3025_s2 + $0x90] sm:$0xff]  }
 0x5ab   :  { %2223 = vmatprep.mubr.msk.f32.mxu1 %vm139_vm1, %v446_v29  ;;  %v2484_v29 = vld [vmem:[%s3025_s2 + $0x98] sm:$0xff]  }
 0x5ac   :  { %2224 = vmatmul.mubr.msk.f32.vlgmr.msra.gmra.mrb[6].mxu1 %vm139_vm1, %v447_v30  ;;  %v2485_v30 = vld [vmem:[%s3025_s2 + $0xa0] sm:$0xff]  }
 0x5ad   :  { %2228 = vmatprep.mubr.msk.bf16.mxu1 %vm2574_vm0, %v2573_v0  ;;  %2227 = vmatpush3.bf16.msra.mxu1 %v2473_v19  ;;  %v2486_v19 = vld [vmem:[%s3025_s2 + $0xa8] sm:$0xff]  }
 0x5ae   :  { %2232 = vmatprep.subr.bf16.mxu1 %v2573_v0 }
 0x67f   :  { %v2225_v31 = vpop.f32.mrb[6].mxu1 }
 0x680   :  { %v526_v32 = vpop.f32.mrb[7].mxu1 }
 0x681   :  { %v535_v34 = vpack.c.bf16 %v2225_v31, %v526_v32  ;;  %v2487_v31 = vld [vmem:[%s3025_s2 + $0xb0] sm:$0xff]   ;;  %v2488_v32 = vld [vmem:[%s3025_s2 + $0xb8] sm:$0xff]  }
 0x683   :  { %2229 = vmatmul.mubr.msk.bf16.vlgmr.msra.gmra.mrb[8].mxu1 %vm139_vm1, %v535_v34  ;;  %v2490_v34 = vld [vmem:[%s3025_s2 + $0xc8] sm:$0xff]  }
 0x684   :  { %2233 = vmatpush3.bf16.msra.mxu1 %v2474_v33  ;;  %2234 = vmatprep.mubr.msk.bf16.mxu1 %vm2574_vm0, %v2573_v0  ;;  %v2489_v33 = vld [vmem:[%s3025_s2 + $0xc0] sm:$0xff]  }
 0x685   :  { %2258 = vmatprep.subr.bf16.mxu1 %v2573_v0 }
 0x68b   :  { %2235 = vmatmul.mubr.msk.bf16.vlgmr.msra.gmra.mrb[12].mxu1 %vm139_vm1, %v332_v61 }
 0x68c   :  { %2274 = vmatprep.mubr.msk.bf16.mxu1 %vm2574_vm0, %v2573_v0  ;;  %2259 = vmatpush3.bf16.msra.mxu1 %v2483_v28 }
 0x68d   :  { %2260 = vmatprep.subr.bf16.mxu1 %v2573_v0 }
 0x690   :  { %2261 = vmatpush3.bf16.msra.mxu1 %v2484_v29 }
 0x691   :  { %2262 = vmatprep.subr.bf16.mxu1 %v2573_v0 }
 0x694   :  { %2263 = vmatpush3.bf16.msra.mxu1 %v2485_v30 }
 0x695   :  { %2264 = vmatprep.subr.bf16.mxu1 %v2573_v0 }
 0x698   :  { %2265 = vmatpush3.bf16.msra.mxu1 %v2486_v19 }
 0x699   :  { %2266 = vmatprep.subr.bf16.mxu1 %v2573_v0 }
 0x69c   :  { %2267 = vmatpush3.bf16.msra.mxu1 %v2487_v31 }
 0x69d   :  { %2268 = vmatprep.subr.bf16.mxu1 %v2573_v0 }
 0x6a0   :  { %2269 = vmatpush3.bf16.msra.mxu1 %v2488_v32 }
 0x6a1   :  { %2270 = vmatprep.subr.bf16.mxu1 %v2573_v0 }
 0x6a4   :  { %2271 = vmatpush3.bf16.msra.mxu1 %v2489_v33 }
 0x6a5   :  { %2272 = vmatprep.subr.bf16.mxu1 %v2573_v0 }
 0x6a8   :  { %2273 = vmatpush3.bf16.msra.mxu1 %v2490_v34 }
 0x756   :  { %v581_v35 = vpop.f32.mrb[8].mxu1 }
 0x757   :  { %v2230_v36 = vpop.f32.mrb[9].mxu1 }
 0x758   :  { %v584_v37 = vpop.f32.mrb[10].mxu1 }
 0x759   :  { %v2231_v38 = vpop.f32.mrb[11].mxu1 }
 0x75e   :  { %v631_v39 = vpop.f32.mrb[12].mxu1 }
 0x75f   :  { %v632_v41 = vadd.f32 %v631_v39, %v581_v35  ;;  %v2236_v42 = vpop.f32.mrb[13].mxu1  ;;  %v1954_v35 = vld [vmem:[%s3027_s3 + $0x4] ss:$0 sm:$0xff] }
 0x760   :  { %v634_v43 = vpop.f32.mrb[14].mxu1 }
 0x761   :  { %v643_v44 = vadd.f32 %v1951_v40, %v632_v41  ;;  %v635_v45 = vadd.f32 %v634_v43, %v584_v37  ;;  %v2237_v46 = vpop.f32.mrb[15].mxu1 }
 0x763   :  { %v644_v47 = vadd.f32 %v1951_v40, %v635_v45  ;;  %v645_v48 = vadd.f32 %v643_v44, %v2641_v9  ;;  %v2477_v9 = vld [vmem:[%s3025_s2 + $0x60] sm:$0xff]  }
 0x764   :  { %2243 = vmatpush3.bf16.msra.mxu0 %v2477_v9 }
 0x765   :  { %649 = vadd.xlane.f32.xlu0 %v645_v48  ;;  %v646_v49 = vadd.f32 %v644_v47, %v2646_v10  ;;  %v655_v51 = vmul.f32 %v645_v48, %v645_v48  ;;  %2244 = vmatprep.subr.bf16.mxu0 %v2573_v0  ;;  %v2478_v10 = vld [vmem:[%s3025_s2 + $0x68] sm:$0xff]  }
 0x767   :  { %v656_v50 = vmul.f32 %v646_v49, %v646_v49 }
 0x768   :  { %2245 = vmatpush3.bf16.msra.mxu0 %v2478_v10 }
 0x769   :  { %651 = vadd.xlane.f32.xlu0 %v646_v49  ;;  %659 = vadd.xlane.f32.xlu1 %v656_v50 }
 0x76a   :  { %2246 = vmatprep.subr.bf16.mxu0 %v2573_v0 }
 0x76c   :  { %2247 = vmatpush3.bf16.msra.mxu0 %v2479_v54 }
 0x76d   :  { %657 = vadd.xlane.f32.xlu0 %v655_v51  ;;  %2248 = vmatprep.subr.bf16.mxu0 %v2573_v0 }
 0x770   :  { %2249 = vmatpush3.bf16.msra.mxu0 %v2480_v55 }
 0x771   :  { %2250 = vmatprep.subr.bf16.mxu0 %v2573_v0 }
 0x774   :  { %2251 = vmatpush3.bf16.msra.mxu0 %v2481_v56 }
 0x775   :  { %2252 = vmatprep.subr.bf16.mxu0 %v2573_v0 }
 0x778   :  { %2253 = vmatpush3.bf16.msra.mxu0 %v2482_v57 }
 0x779   :  { %2278 = vmatprep.subr.bf16.mxu0 %v2573_v0 }
 0x7f2   :  { %v650_v58 = vpop.xlane.xlu0 %649 }
 0x7f3   :  { %v653_v61 = vmul.f32 0.03125, %v650_v58 }
 0x7f5   :  { %v663_v3 = vmul.f32 %v653_v61, %v653_v61  ;;  %v667_v14 = vsub.f32 %v645_v48, %v653_v61 }
 0x7f6   :  { %v652_v59 = vpop.xlane.xlu0 %651  ;;  %v660_v60 = vpop.xlane.xlu1 %659 }
 0x7f7   :  { %v654_v62 = vmul.f32 0.03125, %v652_v59  ;;  %v662_v1 = vmul.f32 0.03125, %v660_v60  ;;  %v1963_v59 = vld [vmem:[%s3027_s3 + $0x5] ss:$0 sm:$0xff] }
 0x7f9   :  { %v664_v63 = vmul.f32 %v654_v62, %v654_v62  ;;  %v668_v11 = vsub.f32 %v646_v49, %v654_v62 }
 0x7fa   :  { %v658_v2 = vpop.xlane.xlu0 %657 }
 0x7fb   :  { %v666_v4 = vsub.f32 %v662_v1, %v664_v63  ;;  %v661_v5 = vmul.f32 0.03125, %v658_v2 }
 0x7fd   :  { %v670_v6 = vadd.f32 1e-12, %v666_v4  ;;  %v665_v7 = vsub.f32 %v661_v5, %v663_v3 }
 0x7ff   :  { %2533 = vrsqrt.f32 %v670_v6  ;;  %v669_v8 = vadd.f32 1e-12, %v665_v7  ;;  %v2491_v7 = vld [vmem:[%s3025_s2 + $0xd0] sm:$0xff]  }
 0x801   :  { %2535 = vrsqrt.f32 %v669_v8  ;;  %v2492_v8 = vld [vmem:[%s3025_s2 + $0xd8] sm:$0xff]  }
 0x809   :  { %v2534_v12 = vpop.eup %2533 }
 0x80a   :  { %v674_v15 = vmul.f32 %v2534_v12, %v668_v11  ;;  %v2493_v11 = vld [vmem:[%s3025_s2 + $0xe0] sm:$0xff]   ;;  %v2494_v12 = vld [vmem:[%s3025_s2 + $0xe8] sm:$0xff]  }
 0x80b   :  { %v2536_v16 = vpop.eup %2535 }
 0x80c   :  { %v673_v17 = vmul.f32 %v2536_v16, %v667_v14  ;;  %v680_v18 = vmul.f32 %v1952_v13, %v674_v15  ;;  %v2496_v14 = vld [vmem:[%s3025_s2 + $0xf8] sm:$0xff]   ;;  %v2497_v15 = vld [vmem:[%s3025_s2 + $0x100] sm:$0xff]   ;;  %v2498_v16 = vld [vmem:[%s3025_s2 + $0x108] sm:$0xff]  }
 0x80e   :  { %v679_v21 = vmul.f32 %v1952_v13, %v673_v17  ;;  %v2773_v24 = vadd.f32 %v1953_v20, %v680_v18  ;;  %v2495_v13 = vld [vmem:[%s3025_s2 + $0xf0] sm:$0xff]  }
 0x810   :  { %v685_v22 = vadd.f32 %v1953_v20, %v679_v21 }
 0x812   :  { %v687_v27 = vpack.c.bf16 %v2773_v24, %v685_v22 }
 0x814   :  { %2255 = vmatmul.mubr.bf16.vlgmr.msra.gmra.mrb[4].mxu0 %v687_v27 }
 0x815   :  { %2294 = vmatprep.mubr.msk.bf16.mxu0 %vm2574_vm0, %v2573_v0  ;;  %2279 = vmatpush3.bf16.msra.mxu0 %v2491_v7 }
 0x816   :  { %2280 = vmatprep.subr.bf16.mxu0 %v2573_v0 }
 0x819   :  { %2281 = vmatpush3.bf16.msra.mxu0 %v2492_v8 }
 0x81a   :  { %2282 = vmatprep.subr.bf16.mxu0 %v2573_v0 }
 0x81d   :  { %2283 = vmatpush3.bf16.msra.mxu0 %v2493_v11 }
 0x81e   :  { %2284 = vmatprep.subr.bf16.mxu0 %v2573_v0 }
 0x821   :  { %2285 = vmatpush3.bf16.msra.mxu0 %v2494_v12 }
 0x822   :  { %2286 = vmatprep.subr.bf16.mxu0 %v2573_v0 }
 0x825   :  { %2287 = vmatpush3.bf16.msra.mxu0 %v2495_v13 }
 0x826   :  { %2288 = vmatprep.subr.bf16.mxu0 %v2573_v0 }
 0x829   :  { %2289 = vmatpush3.bf16.msra.mxu0 %v2496_v14 }
 0x82a   :  { %2290 = vmatprep.subr.bf16.mxu0 %v2573_v0 }
 0x82d   :  { %2291 = vmatpush3.bf16.msra.mxu0 %v2497_v15 }
 0x82e   :  { %2292 = vmatprep.subr.bf16.mxu0 %v2573_v0 }
 0x831   :  { %2293 = vmatpush3.bf16.msra.mxu0 %v2498_v16 }
 0x832   :  { %2332 = vmatprep.subr.bf16.mxu0 %v2573_v0 }
 0x8e7   :  { %v791_v36 = vpop.f32.mrb[4].mxu0 }
 0x8e8   :  { %v792_v37 = vadd.f32 %v1954_v35, %v791_v36  ;;  %v2256_v38 = vpop.f32.mrb[5].mxu0  ;;  %v1972_v36 = vld [vmem:[%s3027_s3 + $0x6] ss:$0 sm:$0xff] }
 0x8e9   :  { %v794_v39 = vpop.f32.mrb[6].mxu0  ;;  %v1973_v38 = vld [vmem:[%s3027_s3 + $0x7] ss:$0 sm:$0xff] }
 0x8ea   :  { %v800_v40 = vmul.f32 0.044715, %v792_v37  ;;  %v795_v41 = vadd.f32 %v1954_v35, %v794_v39  ;;  %v2257_v42 = vpop.f32.mrb[7].mxu0  ;;  %v798_v10 = vmul.f32 0.5, %v792_v37 }
 0x8ec   :  { %v802_v43 = vmul.f32 %v800_v40, %v792_v37  ;;  %v801_v44 = vmul.f32 0.044715, %v795_v41  ;;  %v799_v54 = vmul.f32 0.5, %v795_v41 }
 0x8ee   :  { %v804_v45 = vmul.f32 %v802_v43, %v792_v37  ;;  %v803_v46 = vmul.f32 %v801_v44, %v795_v41 }
 0x8f0   :  { %v806_v47 = vadd.f32 %v804_v45, %v792_v37  ;;  %v805_v48 = vmul.f32 %v803_v46, %v795_v41 }
 0x8f2   :  { %v808_v49 = vmul.f32 0.7978846, %v806_v47  ;;  %v807_v50 = vadd.f32 %v805_v48, %v795_v41  ;;  %v1991_v47 = vld [vmem:[%s3027_s3 + $0x8] ss:$0 sm:$0xff] }
 0x8f4   :  { %2537 = vtanh.f32 %v808_v49  ;;  %v809_v51 = vmul.f32 0.7978846, %v807_v50 }
 0x8f6   :  { %2539 = vtanh.f32 %v809_v51 }
 0x8fe   :  { %v2538_v52 = vpop.eup %2537 }
 0x8ff   :  { %v812_v53 = vadd.f32 1.0, %v2538_v52 }
 0x900   :  { %v2540_v9 = vpop.eup %2539 }
 0x901   :  { %v813_v55 = vadd.f32 1.0, %v2540_v9  ;;  %v814_v56 = vmul.f32 %v812_v53, %v798_v10 }
 0x903   :  { %v815_v57 = vmul.f32 %v813_v55, %v799_v54 }
 0x905   :  { %v816_v58 = vpack.c.bf16 %v815_v57, %v814_v56 }
 0x907   :  { %2275 = vmatmul.mubr.bf16.vlgmr.msra.gmra.mrb[16].mxu1 %v816_v58 }
 0x9da   :  { %v920_v60 = vpop.f32.mrb[16].mxu1 }
 0x9db   :  { %v921_v61 = vadd.f32 %v1963_v59, %v920_v60  ;;  %v2276_v62 = vpop.f32.mrb[17].mxu1 }
 0x9dc   :  { %v923_v63 = vpop.f32.mrb[18].mxu1 }
 0x9dd   :  { %v927_v1 = vadd.f32 %v921_v61, %v685_v22  ;;  %v924_v2 = vadd.f32 %v1963_v59, %v923_v63  ;;  %v2277_v3 = vpop.f32.mrb[19].mxu1 }
 0x9df   :  { %931 = vadd.xlane.f32.xlu0 %v927_v1  ;;  %v928_v4 = vadd.f32 %v924_v2, %v2773_v24  ;;  %v937_v5 = vmul.f32 %v927_v1, %v927_v1 }
 0x9e1   :  { %v938_v6 = vmul.f32 %v928_v4, %v928_v4 }
 0x9e3   :  { %933 = vadd.xlane.f32.xlu0 %v928_v4 }
 0x9e7   :  { %939 = vadd.xlane.f32.xlu0 %v937_v5 }
 0x9eb   :  { %941 = vadd.xlane.f32.xlu0 %v938_v6 }
 0xa6c   :  { %v932_v17 = vpop.xlane.xlu0 %931 }
 0xa6d   :  { %v935_v20 = vmul.f32 0.03125, %v932_v17 }
 0xa6f   :  { %v945_v22 = vmul.f32 %v935_v20, %v935_v20  ;;  %v949_v34 = vsub.f32 %v927_v1, %v935_v20 }
 0xa70   :  { %v934_v18 = vpop.xlane.xlu0 %933 }
 0xa71   :  { %v936_v24 = vmul.f32 0.03125, %v934_v18 }
 0xa73   :  { %v946_v30 = vmul.f32 %v936_v24, %v936_v24  ;;  %v950_v39 = vsub.f32 %v928_v4, %v936_v24 }
 0xa74   :  { %v940_v21 = vpop.xlane.xlu0 %939 }
 0xa75   :  { %v943_v27 = vmul.f32 0.03125, %v940_v21 }
 0xa77   :  { %v947_v28 = vsub.f32 %v943_v27, %v945_v22 }
 0xa78   :  { %v942_v29 = vpop.xlane.xlu0 %941 }
 0xa79   :  { %v951_v19 = vadd.f32 1e-12, %v947_v28  ;;  %v944_v31 = vmul.f32 0.03125, %v942_v29 }
 0xa7b   :  { %2541 = vrsqrt.f32 %v951_v19  ;;  %v948_v32 = vsub.f32 %v944_v31, %v946_v30  ;;  %v2499_v31 = vld [vmem:[%s3025_s2 + $0x110] sm:$0xff]  }
 0xa7d   :  { %v952_v33 = vadd.f32 1e-12, %v948_v32 }
 0xa7f   :  { %2543 = vrsqrt.f32 %v952_v33 }
 0xa85   :  { %v2542_v35 = vpop.eup %2541 }
 0xa86   :  { %v955_v37 = vmul.f32 %v2542_v35, %v949_v34 }
 0xa88   :  { %v961_v40 = vmul.f32 %v1972_v36, %v955_v37 }
 0xa89   :  { %v2544_v41 = vpop.eup %2543 }
 0xa8a   :  { %v956_v42 = vmul.f32 %v2544_v41, %v950_v39  ;;  %v2854_v43 = vadd.f32 %v1973_v38, %v961_v40 }
 0xa8c   :  { %v962_v44 = vmul.f32 %v1972_v36, %v956_v42  ;;  %969 = vst [vmem:[%s3029_s4] sm:$0xff] %v2854_v43 }
 0xa8e   :  { %v2860_v45 = vadd.f32 %v1973_v38, %v962_v44 }
 0xa90   :  { %970 = vst [vmem:[%s3029_s4 + $0x8] sm:$0xff] %v2860_v45  ;;  %v971_v46 = vpack.c.bf16 %v2860_v45, %v2854_v43 }
 0xa92   :  { %2295 = vmatmul.mubr.bf16.vlgmr.msra.gmra.mrb[8].mxu0 %v971_v46 }
 0xa93   :  { %2334 = vmatprep.mubr.msk.bf16.mxu0 %vm2574_vm0, %v2573_v0  ;;  %2333 = vmatpush3.bf16.msra.mxu0 %v2499_v31 }
 0xa94   :  { %2358 = vmatprep.subr.bf16.mxu0 %v2573_v0 }
 0xb65   :  { %v1077_v48 = vpop.f32.mrb[8].mxu0 }
 0xb66   :  { %v1078_v49 = vadd.f32 %v1991_v47, %v1077_v48  ;;  %v2296_v50 = vpop.f32.mrb[9].mxu0 }
 0xb67   :  { %v1080_v51 = vpop.f32.mrb[10].mxu0 }
 0xb68   :  { %v1081_v52 = vadd.f32 %v1991_v47, %v1080_v51  ;;  %v2297_v53 = vpop.f32.mrb[11].mxu0  ;;  %2302 = vmatprep.mubr.msk.f32.mxu1 %vm139_vm1, %v1078_v49 }
 0xb6a   :  { %v2874_v9 = vpack.i.bf16 %v1081_v52, %v1078_v49 }
 0xb6c   :  { %2446 = vrot.lane.b32.xlu0 %v2874_v9, %s2575_s0 }
 0xbde   :  { %v2447_v10 = vpop.permute.xlu0 %2446 }
 0xbdf   :  { %v2449_v54 = vunpack.i.h.bf16 %v2447_v10  ;;  %v2448_v55 = vunpack.i.l.bf16 %v2447_v10 }
 0xbe1   :  { %v2398_v56 = vpack.c.bf16 %v2449_v54, %v2448_v55 }
 0xbe3   :  { %2400 = vmatprep.subr.msk.bf16.mxu1 %vm2664_vm2, %v2398_v56 }
 0xbe4   :  { %2403 = vmatpush3.bf16.xpose.msk.msra.mxu1 %vm2664_vm2, %v2398_v56 }
 0xbeb   :  { %2303 = vmatmul.mubr.msk.f32.vlgmr.msra.gmra.mrb[20].mxu1 %vm139_vm1, %v1081_v52 }
 0xcbe   :  { %v2304_v57 = vpop.f32.mrb[20].mxu1 }
 0xcbf   :  { %v1170_v58 = vadd.f32 %v2304_v57, %v2676_v25  ;;  %v1164_v59 = vpop.f32.mrb[21].mxu1 }
 0xcc0   :  { %v1165_v60 = vadd.f32 %v1164_v59, %v2681_v26 }
 0xcc1   :  { %v1176_v61 = vsel %vm139_vm1, %v1170_v58, -inf }
 0xcc2   :  { %1177 = vmax.xlane.f32.xlu0 %v1176_v61  ;;  %v1173_v62 = vsel %vm139_vm1, %v1165_v60, -inf }
 0xcc3   :  { %1174 = vmax.xlane.f32.xlu1 %v1173_v62  ;;  %v2500_v62 = vld [vmem:[%s3025_s2 + $0x118] sm:$0xff]  }
 0xcd4   :  { %2451 = vrot.lane.b32.xlu1 %v2874_v9, %s2576_s15 }
 0xcd8   :  { %1287 = vrot.lane.b32.xlu0 %v1081_v52, %s2578_s1  ;;  %2456 = vrot.lane.b32.xlu1 %v2874_v9, %s2577_s16 }
 0xd4f   :  { %v1178_v63 = vpop.xlane.xlu0 %1177 }
 0xd50   :  { %v1180_v1 = vsub.f32 %v1170_v58, %v1178_v63  ;;  %v1175_v2 = vpop.xlane.xlu1 %1174 }
 0xd51   :  { %v1179_v3 = vsub.f32 %v1165_v60, %v1175_v2 }
 0xd52   :  { %v1183_v4 = vmul.f32 1.442695, %v1180_v1 }
 0xd53   :  { %v1181_v5 = vmul.f32 1.442695, %v1179_v3  ;;  %v1288_v19 = vpop.permute.xlu0 %1287 }
 0xd54   :  { %2545 = vpow2.f32 %v1183_v4  ;;  %v2452_v6 = vpop.permute.xlu1 %2451  ;;  %v2021_v4 = vld [vmem:[%s3027_s3 + $0x9] ss:$0 sm:$0xff] }
 0xd55   :  { %v2454_v7 = vunpack.i.h.bf16 %v2452_v6  ;;  %v2453_v8 = vunpack.i.l.bf16 %v2452_v6  ;;  %2547 = vpow2.f32 %v1181_v5 }
 0xd57   :  { %v2404_v11 = vpack.c.bf16 %v2454_v7, %v2453_v8 }
 0xd58   :  { %v2457_v12 = vpop.permute.xlu1 %2456 }
 0xd59   :  { %v2459_v13 = vunpack.i.h.bf16 %v2457_v12  ;;  %v2458_v14 = vunpack.i.l.bf16 %v2457_v12  ;;  %2405 = vmatprep.subr.bf16.mxu1 %v2404_v11 }
 0xd5a   :  { %2407 = vmatpush3.bf16.msra.mxu1 %v2404_v11 }
 0xd5b   :  { %v2408_v15 = vpack.c.bf16 %v2459_v13, %v2458_v14 }
 0xd5d   :  { %2410 = vmatprep.subr.msk.bf16.mxu1 %vm2664_vm2, %v2408_v15 }
 0xd5e   :  { %v2546_v16 = vpop.eup %2545 }
 0xd5f   :  { %v1188_v17 = vsel %vm139_vm1, %v2546_v16, 0.0  ;;  %v2548_v18 = vpop.eup %2547 }
 0xd60   :  { %1189 = vadd.xlane.f32.xlu1 %v1188_v17  ;;  %v1185_v20 = vsel %vm139_vm1, %v2548_v18, 0.0 }
 0xd64   :  { %1186 = vadd.xlane.f32.xlu1 %v1185_v20  ;;  %v2502_v20 = vld [vmem:[%s3025_s2 + $0x128] sm:$0xff]  }
 0xd75   :  { %1285 = vrot.lane.b32.xlu1 %v1078_v49, %s2578_s1 }
 0xded   :  { %v1190_v21 = vpop.xlane.xlu1 %1189 }
 0xdee   :  { %2549 = vrcp.f32 %v1190_v21  ;;  %v2505_v21 = vld [vmem:[%s3025_s2 + $0x140] sm:$0xff]  }
 0xdf1   :  { %v1187_v22 = vpop.xlane.xlu1 %1186 }
 0xdf2   :  { %2551 = vrcp.f32 %v1187_v22  ;;  %v2506_v22 = vld [vmem:[%s3025_s2 + $0x148] sm:$0xff]  }
 0xdf5   :  { %v1286_v30 = vpop.permute.xlu1 %1285 }
 0xdf8   :  { %v2550_v24 = vpop.eup %2549 }
 0xdf9   :  { %v1194_v29 = vmul.f32 %v2550_v24, %v2546_v16  ;;  %v2507_v24 = vld [vmem:[%s3025_s2 + $0x150] sm:$0xff]  }
 0xdfc   :  { %v2552_v27 = vpop.eup %2551 }
 0xdfd   :  { %v1193_v28 = vmul.f32 %v2552_v27, %v2548_v18  ;;  %v2501_v18 = vld [vmem:[%s3025_s2 + $0x120] sm:$0xff]   ;;  %v2508_v27 = vld [vmem:[%s3025_s2 + $0x158] sm:$0xff]  }
 0xdff   :  { %2309 = vmatprep.mubr.msk.f32.mxu1 %vm139_vm1, %v1193_v28 }
 0xe00   :  { %2310 = vmatmul.mubr.msk.f32.vlgmr.msra.gmra.mrb[22].mxu1 %vm139_vm1, %v1194_v29 }
 0xe01   :  { %2413 = vmatpush3.bf16.xpose.msk.msra.mxu1 %vm2664_vm2, %v2408_v15  ;;  %2316 = vmatprep.mubr.msk.f32.mxu1 %vm139_vm1, %v1286_v30 }
 0xe08   :  { %2317 = vmatmul.mubr.msk.f32.vlgmr.msra.gmra.mrb[24].mxu1 %vm139_vm1, %v1288_v19 }
 0xed3   :  { %v2311_v32 = vpop.f32.mrb[22].mxu1 }
 0xed4   :  { %v1273_v33 = vpop.f32.mrb[23].mxu1 }
 0xed5   :  { %v1282_v34 = vpack.c.bf16 %v2311_v32, %v1273_v33 }
 0xed7   :  { %2335 = vmatmul.mubr.msk.bf16.vlgmr.msra.gmra.mrb[12].mxu0 %vm139_vm1, %v1282_v34 }
 0xed8   :  { %2374 = vmatprep.mubr.msk.bf16.mxu0 %vm2574_vm0, %v2573_v0 }
 0xedb   :  { %v2318_v23 = vpop.f32.mrb[24].mxu1 }
 0xedc   :  { %v1373_v35 = vadd.f32 %v2318_v23, %v2676_v25  ;;  %v1367_v36 = vpop.f32.mrb[25].mxu1 }
 0xedd   :  { %v1368_v37 = vadd.f32 %v1367_v36, %v2681_v26 }
 0xede   :  { %v1379_v38 = vsel %vm139_vm1, %v1373_v35, -inf }
 0xedf   :  { %1380 = vmax.xlane.f32.xlu0 %v1379_v38  ;;  %v1376_v39 = vsel %vm139_vm1, %v1368_v37, -inf }
 0xee0   :  { %1377 = vmax.xlane.f32.xlu1 %v1376_v39 }
 0xf6c   :  { %v1381_v40 = vpop.xlane.xlu0 %1380 }
 0xf6d   :  { %v1383_v41 = vsub.f32 %v1373_v35, %v1381_v40  ;;  %v1378_v42 = vpop.xlane.xlu1 %1377 }
 0xf6e   :  { %v1382_v44 = vsub.f32 %v1368_v37, %v1378_v42  ;;  %v2024_v42 = vld [vmem:[%s3027_s3 + $0xa] ss:$0 sm:$0xff] }
 0xf6f   :  { %v1386_v46 = vmul.f32 1.442695, %v1383_v41 }
 0xf70   :  { %v1384_v47 = vmul.f32 1.442695, %v1382_v44 }
 0xf71   :  { %2553 = vpow2.f32 %v1386_v46 }
 0xf72   :  { %2555 = vpow2.f32 %v1384_v47 }
 0xf7b   :  { %v2554_v48 = vpop.eup %2553 }
 0xf7c   :  { %v1391_v25 = vsel %vm139_vm1, %v2554_v48, 0.0  ;;  %v2556_v49 = vpop.eup %2555 }
 0xf7d   :  { %1392 = vadd.xlane.f32.xlu1 %v1391_v25  ;;  %v1388_v26 = vsel %vm139_vm1, %v2556_v49, 0.0 }
 0xf81   :  { %1389 = vadd.xlane.f32.xlu1 %v1388_v26 }
 0xf92   :  { %2461 = vrot.lane.b32.xlu1 %v2874_v9, %s2579_s17 }
 0xfaa   :  { %v1581_v50 = vpop.f32.mrb[12].mxu0 }
 0xfab   :  { %v2336_v51 = vpop.f32.mrb[13].mxu0 }
 0xfac   :  { %v1584_v52 = vpop.f32.mrb[14].mxu0 }
 0xfad   :  { %v2337_v53 = vpop.f32.mrb[15].mxu0 }
 0xfae   :  { %v2509_v53 = vld [vmem:[%s3025_s2 + $0x160] sm:$0xff]  }
 0xfaf   :  { %2359 = vmatpush3.bf16.msra.mxu0 %v2509_v53 }
 0xfb0   :  { %2360 = vmatprep.subr.bf16.mxu0 %v2573_v0 }
0x100a   :  { %v1393_v10 = vpop.xlane.xlu1 %1392 }
0x100b   :  { %2557 = vrcp.f32 %v1393_v10  ;;  %v2510_v10 = vld [vmem:[%s3025_s2 + $0x168] sm:$0xff]  }
0x100c   :  { %2361 = vmatpush3.bf16.msra.mxu0 %v2510_v10 }
0x100d   :  { %2362 = vmatprep.subr.bf16.mxu0 %v2573_v0 }
0x100e   :  { %v1390_v54 = vpop.xlane.xlu1 %1389 }
0x100f   :  { %2559 = vrcp.f32 %v1390_v54  ;;  %v2511_v54 = vld [vmem:[%s3025_s2 + $0x170] sm:$0xff]  }
0x1010   :  { %2363 = vmatpush3.bf16.msra.mxu0 %v2511_v54 }
0x1011   :  { %2364 = vmatprep.subr.bf16.mxu0 %v2573_v0 }
0x1012   :  { %v2462_v55 = vpop.permute.xlu1 %2461 }
0x1013   :  { %v2464_v56 = vunpack.i.h.bf16 %v2462_v55  ;;  %v2463_v57 = vunpack.i.l.bf16 %v2462_v55  ;;  %v2512_v55 = vld [vmem:[%s3025_s2 + $0x178] sm:$0xff]  }
0x1014   :  { %2365 = vmatpush3.bf16.msra.mxu0 %v2512_v55 }
0x1015   :  { %v2414_v58 = vpack.c.bf16 %v2464_v56, %v2463_v57  ;;  %v2558_v59 = vpop.eup %2557  ;;  %2366 = vmatprep.subr.bf16.mxu0 %v2573_v0  ;;  %v2513_v56 = vld [vmem:[%s3025_s2 + $0x180] sm:$0xff]   ;;  %v2514_v57 = vld [vmem:[%s3025_s2 + $0x188] sm:$0xff]  }
0x1016   :  { %v1397_v9 = vmul.f32 %v2558_v59, %v2554_v48  ;;  %v2516_v59 = vld [vmem:[%s3025_s2 + $0x198] sm:$0xff]  }
0x1017   :  { %2415 = vmatprep.subr.bf16.mxu1 %v2414_v58 }
0x1018   :  { %2417 = vmatpush3.bf16.msra.mxu1 %v2414_v58  ;;  %2367 = vmatpush3.bf16.msra.mxu0 %v2513_v56  ;;  %v2515_v58 = vld [vmem:[%s3025_s2 + $0x190] sm:$0xff]  }
0x1019   :  { %v2560_v60 = vpop.eup %2559  ;;  %2326 = vmatprep.subr.bf16.mxu1 %v2573_v0  ;;  %2368 = vmatprep.subr.bf16.mxu0 %v2573_v0 }
0x101a   :  { %v1396_v61 = vmul.f32 %v2560_v60, %v2556_v49  ;;  %v2025_v49 = vld [vmem:[%s3027_s3 + $0xb] ss:$0 sm:$0xff]  ;;  %v2043_v60 = vld [vmem:[%s3027_s3 + $0xc] ss:$0 sm:$0xff] }
0x101c   :  { %2323 = vmatprep.mubr.msk.f32.mxu1 %vm139_vm1, %v1396_v61  ;;  %2369 = vmatpush3.bf16.msra.mxu0 %v2514_v57 }
0x101d   :  { %2324 = vmatmul.mubr.msk.f32.vlgmr.msra.gmra.mrb[26].mxu1 %vm139_vm1, %v1397_v9  ;;  %2370 = vmatprep.subr.bf16.mxu0 %v2573_v0 }
0x101e   :  { %2328 = vmatprep.mubr.msk.bf16.mxu1 %vm2574_vm0, %v2573_v0  ;;  %2327 = vmatpush3.bf16.msra.mxu1 %v2500_v62 }
0x101f   :  { %2338 = vmatprep.subr.bf16.mxu1 %v2573_v0 }
0x1020   :  { %2371 = vmatpush3.bf16.msra.mxu0 %v2515_v58 }
0x1021   :  { %2372 = vmatprep.subr.bf16.mxu0 %v2573_v0 }
0x1024   :  { %2373 = vmatpush3.bf16.msra.mxu0 %v2516_v59 }
0x10f0   :  { %v2325_v63 = vpop.f32.mrb[26].mxu1 }
0x10f1   :  { %v1476_v1 = vpop.f32.mrb[27].mxu1 }
0x10f2   :  { %v1485_v2 = vpack.c.bf16 %v2325_v63, %v1476_v1 }
0x10f4   :  { %2329 = vmatmul.mubr.msk.bf16.vlgmr.msra.gmra.mrb[28].mxu1 %vm139_vm1, %v1485_v2 }
0x10f5   :  { %2354 = vmatprep.mubr.msk.bf16.mxu1 %vm2574_vm0, %v2573_v0  ;;  %2339 = vmatpush3.bf16.msra.mxu1 %v2501_v18 }
0x10f6   :  { %2340 = vmatprep.subr.bf16.mxu1 %v2573_v0 }
0x10f9   :  { %2341 = vmatpush3.bf16.msra.mxu1 %v2502_v20 }
0x10fa   :  { %2342 = vmatprep.subr.bf16.mxu1 %v2573_v0 }
0x11c7   :  { %v1531_v3 = vpop.f32.mrb[28].mxu1 }
0x11c8   :  { %v1582_v5 = vadd.f32 %v1581_v50, %v1531_v3  ;;  %v2330_v6 = vpop.f32.mrb[29].mxu1 }
0x11c9   :  { %v1534_v7 = vpop.f32.mrb[30].mxu1 }
0x11ca   :  { %v1593_v8 = vadd.f32 %v2021_v4, %v1582_v5  ;;  %v1585_v11 = vadd.f32 %v1584_v52, %v1534_v7  ;;  %v2331_v12 = vpop.f32.mrb[31].mxu1 }
0x11cc   :  { %v1594_v13 = vadd.f32 %v2021_v4, %v1585_v11  ;;  %v1595_v14 = vadd.f32 %v1593_v8, %v2854_v43  ;;  %v2503_v43 = vld [vmem:[%s3025_s2 + $0x130] sm:$0xff]  }
0x11cd   :  { %2343 = vmatpush3.bf16.msra.mxu1 %v2503_v43 }
0x11ce   :  { %1599 = vadd.xlane.f32.xlu0 %v1595_v14  ;;  %v1596_v15 = vadd.f32 %v1594_v13, %v2860_v45  ;;  %v1605_v17 = vmul.f32 %v1595_v14, %v1595_v14  ;;  %2344 = vmatprep.subr.bf16.mxu1 %v2573_v0  ;;  %v2504_v45 = vld [vmem:[%s3025_s2 + $0x138] sm:$0xff]  }
0x11d0   :  { %v1606_v16 = vmul.f32 %v1596_v15, %v1596_v15 }
0x11d1   :  { %2345 = vmatpush3.bf16.msra.mxu1 %v2504_v45 }
0x11d2   :  { %1601 = vadd.xlane.f32.xlu0 %v1596_v15  ;;  %1609 = vadd.xlane.f32.xlu1 %v1606_v16 }
0x11d3   :  { %2346 = vmatprep.subr.bf16.mxu1 %v2573_v0 }
0x11d5   :  { %2347 = vmatpush3.bf16.msra.mxu1 %v2505_v21 }
0x11d6   :  { %1607 = vadd.xlane.f32.xlu0 %v1605_v17  ;;  %2348 = vmatprep.subr.bf16.mxu1 %v2573_v0 }
0x11d9   :  { %2349 = vmatpush3.bf16.msra.mxu1 %v2506_v22  ;;  %v2069_v22 = vld [vmem:[%s3027_s3 + $0xd] ss:$0 sm:$0xff] }
0x11da   :  { %2350 = vmatprep.subr.bf16.mxu1 %v2573_v0 }
0x11dd   :  { %2351 = vmatpush3.bf16.msra.mxu1 %v2507_v24 }
0x11de   :  { %2352 = vmatprep.subr.bf16.mxu1 %v2573_v0 }
0x11e1   :  { %2353 = vmatpush3.bf16.msra.mxu1 %v2508_v27 }
0x125b   :  { %v1600_v28 = vpop.xlane.xlu0 %1599 }
0x125c   :  { %v1603_v19 = vmul.f32 0.03125, %v1600_v28 }
0x125e   :  { %v1613_v23 = vmul.f32 %v1603_v19, %v1603_v19  ;;  %v1617_v44 = vsub.f32 %v1595_v14, %v1603_v19 }
0x125f   :  { %v1602_v29 = vpop.xlane.xlu0 %1601  ;;  %v1610_v30 = vpop.xlane.xlu1 %1609 }
0x1260   :  { %v1604_v31 = vmul.f32 0.03125, %v1602_v29  ;;  %v1612_v33 = vmul.f32 0.03125, %v1610_v30 }
0x1262   :  { %v1614_v32 = vmul.f32 %v1604_v31, %v1604_v31  ;;  %v1618_v40 = vsub.f32 %v1596_v15, %v1604_v31 }
0x1263   :  { %v1608_v34 = vpop.xlane.xlu0 %1607 }
0x1264   :  { %v1616_v35 = vsub.f32 %v1612_v33, %v1614_v32  ;;  %v1611_v36 = vmul.f32 0.03125, %v1608_v34 }
0x1266   :  { %v1620_v37 = vadd.f32 1e-12, %v1616_v35  ;;  %v1615_v38 = vsub.f32 %v1611_v36, %v1613_v23 }
0x1268   :  { %2561 = vrsqrt.f32 %v1620_v37  ;;  %v1619_v39 = vadd.f32 1e-12, %v1615_v38 }
0x126a   :  { %2563 = vrsqrt.f32 %v1619_v39 }
0x1272   :  { %v2562_v41 = vpop.eup %2561 }
0x1273   :  { %v1624_v46 = vmul.f32 %v2562_v41, %v1618_v40 }
0x1274   :  { %v2564_v47 = vpop.eup %2563 }
0x1275   :  { %v1623_v48 = vmul.f32 %v2564_v47, %v1617_v44  ;;  %v1630_v25 = vmul.f32 %v2024_v42, %v1624_v46 }
0x1277   :  { %v1629_v26 = vmul.f32 %v2024_v42, %v1623_v48  ;;  %v2972_v51 = vadd.f32 %v2025_v49, %v1630_v25 }
0x1279   :  { %v1635_v50 = vadd.f32 %v2025_v49, %v1629_v26 }
0x127b   :  { %v1637_v52 = vpack.c.bf16 %v2972_v51, %v1635_v50 }
0x127d   :  { %2355 = vmatmul.mubr.bf16.vlgmr.msra.gmra.mrb[32].mxu1 %v1637_v52  ;;  %v2081_v52 = vld [vmem:[%s3027_s3 + $0xf] ss:$0 sm:$0xff] }
0x1350   :  { %v1741_v61 = vpop.f32.mrb[32].mxu1 }
0x1351   :  { %v1742_v9 = vadd.f32 %v2043_v60, %v1741_v61  ;;  %v2356_v62 = vpop.f32.mrb[33].mxu1 }
0x1352   :  { %v1744_v63 = vpop.f32.mrb[34].mxu1 }
0x1353   :  { %v1750_v1 = vmul.f32 0.044715, %v1742_v9  ;;  %v1745_v2 = vadd.f32 %v2043_v60, %v1744_v63  ;;  %v2357_v3 = vpop.f32.mrb[35].mxu1  ;;  %v1748_v17 = vmul.f32 0.5, %v1742_v9 }
0x1355   :  { %v1752_v4 = vmul.f32 %v1750_v1, %v1742_v9  ;;  %v1751_v5 = vmul.f32 0.044715, %v1745_v2  ;;  %v1749_v18 = vmul.f32 0.5, %v1745_v2 }
0x1357   :  { %v1754_v6 = vmul.f32 %v1752_v4, %v1742_v9  ;;  %v1753_v7 = vmul.f32 %v1751_v5, %v1745_v2 }
0x1359   :  { %v1756_v8 = vadd.f32 %v1754_v6, %v1742_v9  ;;  %v1755_v11 = vmul.f32 %v1753_v7, %v1745_v2 }
0x135b   :  { %v1758_v12 = vmul.f32 0.7978846, %v1756_v8  ;;  %v1757_v0 = vadd.f32 %v1755_v11, %v1745_v2 }
0x135d   :  { %2565 = vtanh.f32 %v1758_v12  ;;  %v1759_v13 = vmul.f32 0.7978846, %v1757_v0 }
0x135f   :  { %2567 = vtanh.f32 %v1759_v13 }
0x1367   :  { %v2566_v14 = vpop.eup %2565 }
0x1368   :  { %v1762_v15 = vadd.f32 1.0, %v2566_v14 }
0x1369   :  { %v2568_v16 = vpop.eup %2567 }
0x136a   :  { %v1763_v20 = vadd.f32 1.0, %v2568_v16  ;;  %v1764_v43 = vmul.f32 %v1762_v15, %v1748_v17 }
0x136c   :  { %v1765_v45 = vmul.f32 %v1763_v20, %v1749_v18 }
0x136e   :  { %v1766_v21 = vpack.c.bf16 %v1765_v45, %v1764_v43 }
0x1370   :  { %2375 = vmatmul.mubr.bf16.vlgmr.msra.gmra.mrb[16].mxu0 %v1766_v21 }
0x1443   :  { %v1870_v24 = vpop.f32.mrb[16].mxu0 }
0x1444   :  { %v1871_v27 = vadd.f32 %v2069_v22, %v1870_v24  ;;  %v2376_v28 = vpop.f32.mrb[17].mxu0 }
0x1445   :  { %v1873_v29 = vpop.f32.mrb[18].mxu0 }
0x1446   :  { %v1877_v30 = vadd.f32 %v1871_v27, %v1635_v50  ;;  %v1874_v19 = vadd.f32 %v2069_v22, %v1873_v29  ;;  %v2377_v31 = vpop.f32.mrb[19].mxu0  ;;  %v2080_v50 = vld [vmem:[%s3027_s3 + $0xe] ss:$0 sm:$0xff] }
0x1448   :  { %1881 = vadd.xlane.f32.xlu0 %v1877_v30  ;;  %v1878_v32 = vadd.f32 %v1874_v19, %v2972_v51  ;;  %v1887_v33 = vmul.f32 %v1877_v30, %v1877_v30 }
0x144a   :  { %v1888_v34 = vmul.f32 %v1878_v32, %v1878_v32 }
0x144c   :  { %1883 = vadd.xlane.f32.xlu0 %v1878_v32 }
0x1450   :  { %1889 = vadd.xlane.f32.xlu0 %v1887_v33 }
0x1454   :  { %1891 = vadd.xlane.f32.xlu0 %v1888_v34 }
0x14d5   :  { %v1882_v23 = vpop.xlane.xlu0 %1881 }
0x14d6   :  { %v1885_v36 = vmul.f32 0.03125, %v1882_v23 }
0x14d8   :  { %v1895_v38 = vmul.f32 %v1885_v36, %v1885_v36  ;;  %v1899_v49 = vsub.f32 %v1877_v30, %v1885_v36 }
0x14d9   :  { %v1884_v35 = vpop.xlane.xlu0 %1883 }
0x14da   :  { %v1886_v39 = vmul.f32 0.03125, %v1884_v35 }
0x14dc   :  { %v1896_v44 = vmul.f32 %v1886_v39, %v1886_v39  ;;  %v1900_v53 = vsub.f32 %v1878_v32, %v1886_v39 }
0x14dd   :  { %v1890_v37 = vpop.xlane.xlu0 %1889 }
0x14de   :  { %v1893_v40 = vmul.f32 0.03125, %v1890_v37 }
0x14e0   :  { %v1897_v41 = vsub.f32 %v1893_v40, %v1895_v38 }
0x14e1   :  { %v1892_v42 = vpop.xlane.xlu0 %1891 }
0x14e2   :  { %v1901_v46 = vadd.f32 1e-12, %v1897_v41  ;;  %v1894_v47 = vmul.f32 0.03125, %v1892_v42 }
0x14e4   :  { %2569 = vrsqrt.f32 %v1901_v46  ;;  %v1898_v48 = vsub.f32 %v1894_v47, %v1896_v44 }
0x14e6   :  { %v1902_v25 = vadd.f32 1e-12, %v1898_v48 }
0x14e8   :  { %2571 = vrsqrt.f32 %v1902_v25 }
0x14ee   :  { %v2570_v26 = vpop.eup %2569 }
0x14ef   :  { %v1905_v51 = vmul.f32 %v2570_v26, %v1899_v49 }
0x14f1   :  { %v1911_v10 = vmul.f32 %v2080_v50, %v1905_v51 }
0x14f2   :  { %v2572_v54 = vpop.eup %2571 }
0x14f3   :  { %v1917_v55 = vadd.f32 %v2081_v52, %v1911_v10  ;;  %v1906_v56 = vmul.f32 %v2572_v54, %v1900_v53 }
0x14f5   :  { %2082 = vst [vmem:[%s3029_s4 + $0x10] sm:$0xff] %v1917_v55  ;;  %v1912_v57 = vmul.f32 %v2080_v50, %v1906_v56 }
0x14f7   :  { %v1918_v58 = vadd.f32 %v2081_v52, %v1912_v57 }
0x14f9   :  { %2083 = vst [vmem:[%s3029_s4 + $0x18] sm:$0xff] %v1918_v58 }

</bundles_post_ra>
